<compile_context>
chip_gen: v5e
topology: v5e:2x2
jax: 0.10.0
libtpu: 0.0.40
codegen_flags: <defaults>
</compile_context>

<pallas_src>
import jax
import jax.numpy as jnp
from jax.experimental import pallas as pl
from jax.experimental.pallas import tpu as pltpu


# ------------------------------- Pallas kernel --------------------------------
def bottleneck_kernel(x_ref, xh_ref, w1_ref, b1_ref, w2_ref, b2_ref,
                      w3_ref, b3_ref, o_ref, hpad_ref):
    # x_ref : (1, TH, W, Cin) f32   row strip of the image
    # xh_ref: (1, 2,  W, Cin) f32   [row above strip, row below strip] (clamped)
    # w*_ref: BN-folded bf16 weights; b*_ref f32 biases
    #   w1: (Cin, P)   w2: (3, 3P, P)  (per-ky, K index = kx*P + ci)   w3: (P, Cin)
    # o_ref : (1, TH, W, Cin) out_dtype
    # hpad  : (TH+2, W, 3P) bf16    three horizontally-shifted h1 planes,
    #                               channel-concatenated (kx*P + ci)
    s = pl.program_id(1)
    n_s = pl.num_programs(1)
    _, TH, W, Cin = x_ref.shape
    P = w1_ref.shape[1]                                  # lane-padded planes

    x_f32 = x_ref[0]                                     # (TH, W, Cin) f32
    x2d = x_f32.reshape(TH * W, Cin)                     # residual (full precision)
    xb = x2d.astype(jnp.bfloat16)                        # MXU operand

    w1 = w1_ref[...]
    b1 = b1_ref[...]                                     # (1, P) f32

    # ---- conv1 (1x1) + bn1 + relu on the strip body (MXU, f32 accum) ----
    h1 = jnp.dot(xb, w1, preferred_element_type=jnp.float32)
    h1 = jnp.maximum(h1 + b1, 0.0).astype(jnp.bfloat16)  # (TH*W, P) bf16
    h1_img = h1.reshape(TH, W, P)

    # ---- conv1 + bn1 + relu on the two halo rows; mask to zero at the image
    #      borders, reproducing conv2's zero padding in h1-space ----
    xh = xh_ref[0].astype(jnp.bfloat16).reshape(2 * W, Cin)
    hh = jnp.dot(xh, w1, preferred_element_type=jnp.float32)
    hh = jnp.maximum(hh + b1, 0.0).reshape(2, W, P)
    top = jnp.where(s > 0, hh[0], 0.0).astype(jnp.bfloat16)          # (W, P)
    bot = jnp.where(s < n_s - 1, hh[1], 0.0).astype(jnp.bfloat16)    # (W, P)

    # ---- pad-once (bf16): strip + vertical halo, then the 3 horizontally
    #      shifted planes stored as lane-aligned sub-slabs of the scratch ----
    h1_ext = jnp.concatenate([top[None], h1_img, bot[None]], axis=0)  # (TH+2, W, P)
    zcol = jnp.zeros((TH + 2, 1, P), jnp.bfloat16)
    # kx = 0 : column x reads h1 column x-1 (zero at x = 0)
    hpad_ref[:, :, 0:P] = jnp.concatenate([zcol, h1_ext[:, :W - 1]], axis=1)
    # kx = 1 : center plane
    hpad_ref[:, :, P:2 * P] = h1_ext
    # kx = 2 : column x reads h1 column x+1 (zero at x = W-1)
    hpad_ref[:, :, 2 * P:3 * P] = jnp.concatenate([h1_ext[:, 1:], zcol], axis=1)

    # ---- conv2 (3x3, pad=1) + bn2 + relu: 3 wide-K matmuls (one per ky),
    #      contiguous leading-row window loads, 2 accumulator adds ----
    acc = None
    for ky in range(3):                                  # static unrolled
        win = hpad_ref[ky:ky + TH, :, :].reshape(TH * W, 3 * P)       # bf16
        part = jnp.dot(win, w2_ref[ky], preferred_element_type=jnp.float32)
        acc = part if acc is None else acc + part
    h2 = jnp.maximum(acc + b2_ref[...], 0.0).astype(jnp.bfloat16)     # (TH*W, P)

    # ---- conv3 (1x1) + bn3 + residual add (f32) + relu ----
    h3 = jnp.dot(h2, w3_ref[...], preferred_element_type=jnp.float32) # (TH*W, Cin)
    h3 = jnp.maximum(h3 + b3_ref[...] + x2d, 0.0)
    o_ref[...] = h3.reshape(1, TH, W, Cin).astype(o_ref.dtype)


# --------------------------------- wrappers ------------------------------------
def _vmem_plan():
    """Generation-aware (budget_for_strip_selection, compiler vmem limit)."""
    cap = 64 * 1024 * 1024                               # conservative (v7x per-TC)
    try:
        info = pltpu.get_tpu_info()
        for attr in ("vmem_capacity_bytes", "vmem_bytes", "vmem_size_bytes"):
            v = getattr(info, attr, None)
            if v:
                cap = int(v)
                break
    except Exception:
        pass
    budget = cap * 3 // 8            # per-strip working-set budget
    limit = cap * 4 // 5             # scoped VMEM limit, headroom kept
    return budget, limit


def _pick_tile_h(N, H, W, cin, P, out_bytes):
    """Largest divisor of H whose per-strip working set fits the VMEM budget;
    keeps >= 2 grid steps when N == 1 (megacore on v7x)."""
    budget, _ = _vmem_plan()
    divs = sorted((d for d in range(1, H + 1) if H % d == 0), reverse=True)
    if N == 1 and H > 1:
        divs = [d for d in divs if d < H] or divs
    for th in divs:
        x_b = 2 * th * W * cin * 4                       # f32 input strip, dbl-buf
        o_b = 2 * th * W * cin * out_bytes               # output strip, dbl-buf
        halo_b = 2 * 2 * W * cin * 4
        pad_b = (th + 2) * W * 3 * P * 2                 # bf16 pad-once scratch
        live_b = th * W * P * 12 + 2 * (th + 2) * W * P * 2   # h1/acc/h2/shift temps
        w_b = 2 * (3 * 3 * P * P + 2 * cin * P) * 2 + 4 * (3 * P + cin)
        if x_b + o_b + halo_b + pad_b + live_b + w_b <= budget:
            return th
    return 1


def bottleneck_pallas_nhwc(x_nhwc, params, tile_h=None, out_dtype=None):
    """x_nhwc: (N, H, W, Cin). Returns (N, H, W, Cin) in out_dtype (default x dtype)."""
    (w1, b1, w2, b2, w3, b3) = params
    N, H, W, Cin = x_nhwc.shape
    P = w1.shape[1]
    assert w1.shape[0] == Cin and w3.shape[1] == Cin, \
        "downsample=None requires inplanes == planes * 4"
    out_dtype = x_nhwc.dtype if out_dtype is None else out_dtype

    if tile_h is None:
        tile_h = _pick_tile_h(N, H, W, Cin, P, jnp.dtype(out_dtype).itemsize)
    TH = tile_h
    assert H % TH == 0, "tile_h must divide H"
    S = H // TH

    # Per-strip halo rows (row above / row below each strip), clamped indices.
    # Out-of-image rows are masked to zero in h1-space inside the kernel.
    top_idx = jnp.clip(jnp.arange(S) * TH - 1, 0, H - 1)
    bot_idx = jnp.clip(jnp.arange(S) * TH + TH, 0, H - 1)
    halo_idx = jnp.stack([top_idx, bot_idx], axis=1)          # (S, 2)
    x_halo = x_nhwc[:, halo_idx].reshape(N, S * 2, W, Cin)    # (N, 2S, W, Cin)

    full = lambda a: pl.BlockSpec(a.shape, lambda n, s: (0,) * a.ndim)
    _, vmem_limit = _vmem_plan()

    out = pl.pallas_call(
        bottleneck_kernel,
        out_shape=jax.ShapeDtypeStruct((N, H, W, Cin), out_dtype),
        grid=(N, S),
        in_specs=[
            pl.BlockSpec((1, TH, W, Cin), lambda n, s: (n, s, 0, 0)),   # x strip
            pl.BlockSpec((1, 2, W, Cin), lambda n, s: (n, s, 0, 0)),    # halo rows
            full(w1), full(b1), full(w2), full(b2), full(w3), full(b3),
        ],
        out_specs=pl.BlockSpec((1, TH, W, Cin), lambda n, s: (n, s, 0, 0)),
        scratch_shapes=[pltpu.VMEM((TH + 2, W, 3 * P), jnp.bfloat16)],
        compiler_params=pltpu.CompilerParams(
            dimension_semantics=("parallel", "parallel"),
            vmem_limit_bytes=int(vmem_limit)),
    )(x_nhwc, x_halo, w1, b1, w2, b2, w3, b3)
    return out


def bottleneck_pallas(x_nchw, params, tile_h=None, out_dtype=None):
    """NCHW wrapper for PyTorch interface parity (transposes only at this
    boundary; keep the surrounding model NHWC to avoid them)."""
    x_nhwc = jnp.transpose(x_nchw, (0, 2, 3, 1))
    y = bottleneck_pallas_nhwc(x_nhwc, params, tile_h=tile_h, out_dtype=out_dtype)
    return jnp.transpose(y, (0, 3, 1, 2))


# ------------------------- reference (plain JAX, NCHW) -------------------------
def _conv_nchw(x, w, pad):
    return jax.lax.conv_general_dilated(
        x, w, window_strides=(1, 1), padding=[(pad, pad), (pad, pad)],
        dimension_numbers=("NCHW", "OIHW", "NCHW"))


def _bn(x, gamma, beta, mean, var, eps=1e-5):
    g = gamma[None, :, None, None]
    b = beta[None, :, None, None]
    m = mean[None, :, None, None]
    v = var[None, :, None, None]
    return (x - m) * g / jnp.sqrt(v + eps) + b


def bottleneck_ref(x, torch_params):
    (w1, bn1, w2, bn2, w3, bn3) = torch_params
    out = jax.nn.relu(_bn(_conv_nchw(x, w1, 0), *bn1))
    out = jax.nn.relu(_bn(_conv_nchw(out, w2, 1), *bn2))
    out = _bn(_conv_nchw(out, w3, 0), *bn3)
    return jax.nn.relu(out + x)


# ------------------------------- param helpers --------------------------------
def _round_up(v, m):
    return ((v + m - 1) // m) * m


def fold_params(torch_params, eps=1e-5, lane=128):
    """Fold BN (running stats) into the conv weights, pad the intermediate
    channel dim to a lane-dense multiple of 128, cast weights to bf16, and lay
    conv2 out as 3 per-ky weights of shape (3P, P) with K index = kx*P + ci."""
    (w1_t, bn1, w2_t, bn2, w3_t, bn3) = torch_params
    planes, inplanes = w1_t.shape[0], w1_t.shape[1]
    cout = w3_t.shape[0]
    P = _round_up(max(planes, 1), lane)

    def scale_bias(bn):
        gamma, beta, mean, var = bn
        sc = gamma / jnp.sqrt(var + eps)
        return sc, beta - mean * sc

    s1, b1 = scale_bias(bn1)
    s2, b2 = scale_bias(bn2)
    s3, b3 = scale_bias(bn3)

    # conv1: OIHW (planes, Cin, 1, 1) -> (Cin, P), BN scale folded into columns.
    w1 = jnp.transpose(w1_t[:, :, 0, 0]) * s1[None, :]
    w1 = jnp.pad(w1, ((0, 0), (0, P - planes))).astype(jnp.bfloat16)
    b1p = jnp.pad(b1, (0, P - planes))[None, :].astype(jnp.float32)

    # conv2: OIHW (co, ci, ky, kx) -> (ky, kx, ci, co); fold BN scale on co,
    # zero-pad ci/co -> P, flatten (kx, ci) into the wide contraction K = 3P.
    w2 = jnp.transpose(w2_t, (2, 3, 1, 0)) * s2[None, None, None, :]
    w2 = jnp.pad(w2, ((0, 0), (0, 0), (0, P - planes), (0, P - planes)))
    w2 = w2.reshape(3, 3 * P, P).astype(jnp.bfloat16)
    b2p = jnp.pad(b2, (0, P - planes))[None, :].astype(jnp.float32)

    # conv3: OIHW (4*planes, planes, 1, 1) -> (P, Cout).
    w3 = jnp.transpose(w3_t[:, :, 0, 0]) * s3[None, :]
    w3 = jnp.pad(w3, ((0, P - planes), (0, 0))).astype(jnp.bfloat16)
    b3p = b3[None, :].astype(jnp.float32)

    assert cout == inplanes
    return (w1, b1p, w2, b2p, w3, b3p)


def make_params(key, inplanes, planes):
    ks = jax.random.split(key, 6)
    w1_t = jax.random.normal(ks[0], (planes, inplanes, 1, 1), jnp.float32) * 0.1
    w2_t = jax.random.normal(ks[1], (planes, planes, 3, 3), jnp.float32) * 0.1
    w3_t = jax.random.normal(ks[2], (planes * 4, planes, 1, 1), jnp.float32) * 0.1

    def bn_params(k, c):
        k1, k2, k3, k4 = jax.random.split(k, 4)
        gamma = 1.0 + 0.1 * jax.random.normal(k1, (c,), jnp.float32)
        beta = 0.1 * jax.random.normal(k2, (c,), jnp.float32)
        mean = 0.1 * jax.random.normal(k3, (c,), jnp.float32)
        var = 1.0 + 0.5 * jax.random.uniform(k4, (c,), jnp.float32)
        return gamma, beta, mean, var

    bn1 = bn_params(ks[3], planes)
    bn2 = bn_params(ks[4], planes)
    bn3 = bn_params(ks[5], planes * 4)

    torch_params = (w1_t, bn1, w2_t, bn2, w3_t, bn3)
    kernel_params = fold_params(torch_params)
    return torch_params, kernel_params


if __name__ == "__main__":
    N, planes, H, W = 2, 4, 16, 16
    inplanes = planes * 4            # downsample=None requires inplanes == 4*planes

    key = jax.random.PRNGKey(0)
    kx_, kp_ = jax.random.split(key)
    x = jax.random.normal(kx_, (N, inplanes, H, W), jnp.float32)

    torch_params, kernel_params = make_params(kp_, inplanes, planes)
    y_ref = jax.block_until_ready(bottleneck_ref(x, torch_params))

    # Multi-strip path (exercises the interior halo exchange): 2 strips of 8 rows.
    y = jax.block_until_ready(bottleneck_pallas(x, kernel_params, tile_h=8))
    assert y.shape == (N, inplanes, H, W)
    err = float(jnp.max(jnp.abs(y - y_ref)))
    # bf16 MXU path -> tolerance reflects bf16 rounding of activations/weights.
    assert jnp.allclose(y, y_ref, atol=3e-2, rtol=3e-2), err

    # Single-strip (auto tile) path: both halo rows masked to zero.
    y2 = jax.block_until_ready(bottleneck_pallas(x, kernel_params))
    err2 = float(jnp.max(jnp.abs(y2 - y_ref)))
    assert jnp.allclose(y2, y_ref, atol=3e-2, rtol=3e-2), err2

    print("KERNEL_OK")
</pallas_src>

<mosaic_0001>
module attributes {stable_mosaic.version = 11 : i64} {
  func.func @bottleneck_kernel(%arg0: i32, %arg1: i32, %arg2: memref<1x8x16x16xf32, #tpu.memory_space<vmem>>, %arg3: memref<1x2x16x16xf32, #tpu.memory_space<vmem>>, %arg4: memref<16x128xbf16, #tpu.memory_space<vmem>>, %arg5: memref<1x128xf32, #tpu.memory_space<vmem>>, %arg6: memref<3x384x128xbf16, #tpu.memory_space<vmem>>, %arg7: memref<1x128xf32, #tpu.memory_space<vmem>>, %arg8: memref<128x16xbf16, #tpu.memory_space<vmem>>, %arg9: memref<1x16xf32, #tpu.memory_space<vmem>>, %arg10: memref<1x8x16x16xf32, #tpu.memory_space<vmem>>, %arg11: memref<10x16x384xbf16, #tpu.memory_space<vmem>>) attributes {dimension_semantics = [#tpu.dimension_semantics<parallel>, #tpu.dimension_semantics<parallel>], iteration_bounds = array<i64: 2, 2>, scalar_prefetch = 0 : i64, scratch_operands = 1 : i64, tpu.core_type = #tpu.core_type<tc>, window_params = [{transform_indices = @transform_0, window_bounds = array<i64: 1, 8, 16, 16>}, {transform_indices = @transform_1, window_bounds = array<i64: 1, 2, 16, 16>}, {pipeline_mode = #tpu.pipeline_mode<synchronous>, transform_indices = @transform_2, window_bounds = array<i64: 16, 128>}, {pipeline_mode = #tpu.pipeline_mode<synchronous>, transform_indices = @transform_3, window_bounds = array<i64: 1, 128>}, {pipeline_mode = #tpu.pipeline_mode<synchronous>, transform_indices = @transform_4, window_bounds = array<i64: 3, 384, 128>}, {pipeline_mode = #tpu.pipeline_mode<synchronous>, transform_indices = @transform_5, window_bounds = array<i64: 1, 128>}, {pipeline_mode = #tpu.pipeline_mode<synchronous>, transform_indices = @transform_6, window_bounds = array<i64: 128, 16>}, {pipeline_mode = #tpu.pipeline_mode<synchronous>, transform_indices = @transform_7, window_bounds = array<i64: 1, 16>}, {transform_indices = @transform_8, window_bounds = array<i64: 1, 8, 16, 16>}]} {
    %c0 = arith.constant 0 : index
    %c0_0 = arith.constant 0 : index
    %c0_1 = arith.constant 0 : index
    %c0_2 = arith.constant 0 : index
    %0 = vector.load %arg2[%c0, %c0_0, %c0_1, %c0_2] : memref<1x8x16x16xf32, #tpu.memory_space<vmem>>, vector<1x8x16x16xf32>
    %1 = vector.shape_cast %0 : vector<1x8x16x16xf32> to vector<8x16x16xf32>
    %2 = vector.shape_cast %1 : vector<8x16x16xf32> to vector<128x16xf32>
    %3 = arith.truncf %2 : vector<128x16xf32> to vector<128x16xbf16>
    %c0_3 = arith.constant 0 : index
    %c0_4 = arith.constant 0 : index
    %4 = vector.load %arg4[%c0_3, %c0_4] : memref<16x128xbf16, #tpu.memory_space<vmem>>, vector<16x128xbf16>
    %c0_5 = arith.constant 0 : index
    %c0_6 = arith.constant 0 : index
    %5 = vector.load %arg5[%c0_5, %c0_6] : memref<1x128xf32, #tpu.memory_space<vmem>>, vector<1x128xf32>
    %cst = arith.constant dense<0.000000e+00> : vector<128x128xf32>
    %6 = tpu.matmul %3, %4, %cst {dimension_numbers = #tpu.dot_dimension_numbers<[1], [0], [0], [1], [0, 0, 1, 1], [], []>} : vector<128x16xbf16>, vector<16x128xbf16>, vector<128x128xf32> -> vector<128x128xf32>
    %7 = vector.broadcast %5 : vector<1x128xf32> to vector<128x128xf32>
    %8 = arith.addf %6, %7 : vector<128x128xf32>
    %cst_7 = arith.constant 0.000000e+00 : f32
    %9 = vector.broadcast %cst_7 : f32 to vector<128x128xf32>
    %10 = arith.maximumf %8, %9 : vector<128x128xf32>
    %11 = arith.truncf %10 : vector<128x128xf32> to vector<128x128xbf16>
    %12 = vector.shape_cast %11 : vector<128x128xbf16> to vector<8x16x128xbf16>
    %c0_8 = arith.constant 0 : index
    %c0_9 = arith.constant 0 : index
    %c0_10 = arith.constant 0 : index
    %c0_11 = arith.constant 0 : index
    %13 = vector.load %arg3[%c0_8, %c0_9, %c0_10, %c0_11] : memref<1x2x16x16xf32, #tpu.memory_space<vmem>>, vector<1x2x16x16xf32>
    %14 = vector.shape_cast %13 : vector<1x2x16x16xf32> to vector<2x16x16xf32>
    %15 = arith.truncf %14 : vector<2x16x16xf32> to vector<2x16x16xbf16>
    %16 = vector.shape_cast %15 : vector<2x16x16xbf16> to vector<32x16xbf16>
    %cst_12 = arith.constant dense<0.000000e+00> : vector<32x128xf32>
    %17 = tpu.matmul %16, %4, %cst_12 {dimension_numbers = #tpu.dot_dimension_numbers<[1], [0], [0], [1], [0, 0, 1, 1], [], []>} : vector<32x16xbf16>, vector<16x128xbf16>, vector<32x128xf32> -> vector<32x128xf32>
    %18 = vector.broadcast %5 : vector<1x128xf32> to vector<32x128xf32>
    %19 = arith.addf %17, %18 : vector<32x128xf32>
    %cst_13 = arith.constant 0.000000e+00 : f32
    %20 = vector.broadcast %cst_13 : f32 to vector<32x128xf32>
    %21 = arith.maximumf %19, %20 : vector<32x128xf32>
    %22 = vector.shape_cast %21 : vector<32x128xf32> to vector<2x16x128xf32>
    %c0_i32 = arith.constant 0 : i32
    %23 = arith.cmpi sgt, %arg1, %c0_i32 : i32
    %24 = vector.extract_strided_slice %22 {offsets = [0, 0, 0], sizes = [1, 16, 128], strides = [1, 1, 1]} : vector<2x16x128xf32> to vector<1x16x128xf32>
    %25 = vector.shape_cast %24 : vector<1x16x128xf32> to vector<16x128xf32>
    %cst_14 = arith.constant 0.000000e+00 : f32
    %26 = vector.broadcast %cst_14 : f32 to vector<16x128xf32>
    %27 = arith.select %23, %25, %26 : vector<16x128xf32>
    %28 = arith.truncf %27 : vector<16x128xf32> to vector<16x128xbf16>
    %c1_i32 = arith.constant 1 : i32
    %29 = arith.cmpi slt, %arg1, %c1_i32 : i32
    %30 = vector.extract_strided_slice %22 {offsets = [1, 0, 0], sizes = [1, 16, 128], strides = [1, 1, 1]} : vector<2x16x128xf32> to vector<1x16x128xf32>
    %31 = vector.shape_cast %30 : vector<1x16x128xf32> to vector<16x128xf32>
    %cst_15 = arith.constant 0.000000e+00 : f32
    %32 = vector.broadcast %cst_15 : f32 to vector<16x128xf32>
    %33 = arith.select %29, %31, %32 : vector<16x128xf32>
    %34 = arith.truncf %33 : vector<16x128xf32> to vector<16x128xbf16>
    %35 = vector.shape_cast %28 : vector<16x128xbf16> to vector<1x16x128xbf16>
    %36 = vector.shape_cast %34 : vector<16x128xbf16> to vector<1x16x128xbf16>
    %37 = tpu.concatenate %35, %12, %36 in 0 : vector<1x16x128xbf16>, vector<8x16x128xbf16>, vector<1x16x128xbf16> -> vector<10x16x128xbf16>
    %cst_16 = arith.constant 0.000000e+00 : bf16
    %38 = vector.broadcast %cst_16 : bf16 to vector<10x1x128xbf16>
    %39 = vector.extract_strided_slice %37 {offsets = [0, 0, 0], sizes = [10, 15, 128], strides = [1, 1, 1]} : vector<10x16x128xbf16> to vector<10x15x128xbf16>
    %40 = tpu.concatenate %38, %39 in 1 : vector<10x1x128xbf16>, vector<10x15x128xbf16> -> vector<10x16x128xbf16>
    %c0_17 = arith.constant 0 : index
    %c0_18 = arith.constant 0 : index
    %c0_19 = arith.constant 0 : index
    %41 = vector.load %arg11[%c0_17, %c0_18, %c0_19] : memref<10x16x384xbf16, #tpu.memory_space<vmem>>, vector<10x16x128xbf16>
    tpu.vector_store %arg11[%c0_17, %c0_18, %c0_19], %40 {strides = array<i32>} : memref<10x16x384xbf16, #tpu.memory_space<vmem>>, vector<10x16x128xbf16>,
    %c0_20 = arith.constant 0 : index
    %c0_21 = arith.constant 0 : index
    %c128 = arith.constant 128 : index
    %42 = vector.load %arg11[%c0_20, %c0_21, %c128] : memref<10x16x384xbf16, #tpu.memory_space<vmem>>, vector<10x16x128xbf16>
    tpu.vector_store %arg11[%c0_20, %c0_21, %c128], %37 {strides = array<i32>} : memref<10x16x384xbf16, #tpu.memory_space<vmem>>, vector<10x16x128xbf16>,
    %43 = vector.extract_strided_slice %37 {offsets = [0, 1, 0], sizes = [10, 15, 128], strides = [1, 1, 1]} : vector<10x16x128xbf16> to vector<10x15x128xbf16>
    %44 = tpu.concatenate %43, %38 in 1 : vector<10x15x128xbf16>, vector<10x1x128xbf16> -> vector<10x16x128xbf16>
    %c0_22 = arith.constant 0 : index
    %c0_23 = arith.constant 0 : index
    %c256 = arith.constant 256 : index
    %45 = vector.load %arg11[%c0_22, %c0_23, %c256] : memref<10x16x384xbf16, #tpu.memory_space<vmem>>, vector<10x16x128xbf16>
    tpu.vector_store %arg11[%c0_22, %c0_23, %c256], %44 {strides = array<i32>} : memref<10x16x384xbf16, #tpu.memory_space<vmem>>, vector<10x16x128xbf16>,
    %c0_24 = arith.constant 0 : index
    %c0_25 = arith.constant 0 : index
    %c0_26 = arith.constant 0 : index
    %46 = vector.load %arg11[%c0_24, %c0_25, %c0_26] : memref<10x16x384xbf16, #tpu.memory_space<vmem>>, vector<8x16x384xbf16>
    %47 = vector.shape_cast %46 : vector<8x16x384xbf16> to vector<128x384xbf16>
    %c0_27 = arith.constant 0 : index
    %c0_28 = arith.constant 0 : index
    %c0_29 = arith.constant 0 : index
    %48 = vector.load %arg6[%c0_27, %c0_28, %c0_29] : memref<3x384x128xbf16, #tpu.memory_space<vmem>>, vector<1x384x128xbf16>
    %49 = vector.shape_cast %48 : vector<1x384x128xbf16> to vector<384x128xbf16>
    %cst_30 = arith.constant dense<0.000000e+00> : vector<128x128xf32>
    %50 = tpu.matmul %47, %49, %cst_30 {dimension_numbers = #tpu.dot_dimension_numbers<[1], [0], [0], [1], [0, 0, 1, 1], [], []>} : vector<128x384xbf16>, vector<384x128xbf16>, vector<128x128xf32> -> vector<128x128xf32>
    %c1 = arith.constant 1 : index
    %c0_31 = arith.constant 0 : index
    %c0_32 = arith.constant 0 : index
    %51 = vector.load %arg11[%c1, %c0_31, %c0_32] : memref<10x16x384xbf16, #tpu.memory_space<vmem>>, vector<8x16x384xbf16>
    %52 = vector.shape_cast %51 : vector<8x16x384xbf16> to vector<128x384xbf16>
    %c1_33 = arith.constant 1 : index
    %c0_34 = arith.constant 0 : index
    %c0_35 = arith.constant 0 : index
    %53 = vector.load %arg6[%c1_33, %c0_34, %c0_35] : memref<3x384x128xbf16, #tpu.memory_space<vmem>>, vector<1x384x128xbf16>
    %54 = vector.shape_cast %53 : vector<1x384x128xbf16> to vector<384x128xbf16>
    %cst_36 = arith.constant dense<0.000000e+00> : vector<128x128xf32>
    %55 = tpu.matmul %52, %54, %cst_36 {dimension_numbers = #tpu.dot_dimension_numbers<[1], [0], [0], [1], [0, 0, 1, 1], [], []>} : vector<128x384xbf16>, vector<384x128xbf16>, vector<128x128xf32> -> vector<128x128xf32>
    %56 = arith.addf %50, %55 : vector<128x128xf32>
    %c2 = arith.constant 2 : index
    %c0_37 = arith.constant 0 : index
    %c0_38 = arith.constant 0 : index
    %57 = vector.load %arg11[%c2, %c0_37, %c0_38] : memref<10x16x384xbf16, #tpu.memory_space<vmem>>, vector<8x16x384xbf16>
    %58 = vector.shape_cast %57 : vector<8x16x384xbf16> to vector<128x384xbf16>
    %c2_39 = arith.constant 2 : index
    %c0_40 = arith.constant 0 : index
    %c0_41 = arith.constant 0 : index
    %59 = vector.load %arg6[%c2_39, %c0_40, %c0_41] : memref<3x384x128xbf16, #tpu.memory_space<vmem>>, vector<1x384x128xbf16>
    %60 = vector.shape_cast %59 : vector<1x384x128xbf16> to vector<384x128xbf16>
    %cst_42 = arith.constant dense<0.000000e+00> : vector<128x128xf32>
    %61 = tpu.matmul %58, %60, %cst_42 {dimension_numbers = #tpu.dot_dimension_numbers<[1], [0], [0], [1], [0, 0, 1, 1], [], []>} : vector<128x384xbf16>, vector<384x128xbf16>, vector<128x128xf32> -> vector<128x128xf32>
    %62 = arith.addf %56, %61 : vector<128x128xf32>
    %c0_43 = arith.constant 0 : index
    %c0_44 = arith.constant 0 : index
    %63 = vector.load %arg7[%c0_43, %c0_44] : memref<1x128xf32, #tpu.memory_space<vmem>>, vector<1x128xf32>
    %64 = vector.broadcast %63 : vector<1x128xf32> to vector<128x128xf32>
    %65 = arith.addf %62, %64 : vector<128x128xf32>
    %cst_45 = arith.constant 0.000000e+00 : f32
    %66 = vector.broadcast %cst_45 : f32 to vector<128x128xf32>
    %67 = arith.maximumf %65, %66 : vector<128x128xf32>
    %68 = arith.truncf %67 : vector<128x128xf32> to vector<128x128xbf16>
    %c0_46 = arith.constant 0 : index
    %c0_47 = arith.constant 0 : index
    %69 = vector.load %arg8[%c0_46, %c0_47] : memref<128x16xbf16, #tpu.memory_space<vmem>>, vector<128x16xbf16>
    %cst_48 = arith.constant dense<0.000000e+00> : vector<128x16xf32>
    %70 = tpu.matmul %68, %69, %cst_48 {dimension_numbers = #tpu.dot_dimension_numbers<[1], [0], [0], [1], [0, 0, 1, 1], [], []>} : vector<128x128xbf16>, vector<128x16xbf16>, vector<128x16xf32> -> vector<128x16xf32>
    %c0_49 = arith.constant 0 : index
    %c0_50 = arith.constant 0 : index
    %71 = vector.load %arg9[%c0_49, %c0_50] : memref<1x16xf32, #tpu.memory_space<vmem>>, vector<1x16xf32>
    %72 = vector.broadcast %71 : vector<1x16xf32> to vector<128x16xf32>
    %73 = arith.addf %70, %72 : vector<128x16xf32>
    %74 = arith.addf %73, %2 : vector<128x16xf32>
    %cst_51 = arith.constant 0.000000e+00 : f32
    %75 = vector.broadcast %cst_51 : f32 to vector<128x16xf32>
    %76 = arith.maximumf %74, %75 : vector<128x16xf32>
    %77 = vector.shape_cast %76 : vector<128x16xf32> to vector<1x8x16x16xf32>
    %c0_52 = arith.constant 0 : index
    %c0_53 = arith.constant 0 : index
    %c0_54 = arith.constant 0 : index
    %c0_55 = arith.constant 0 : index
    %78 = vector.load %arg10[%c0_52, %c0_53, %c0_54, %c0_55] : memref<1x8x16x16xf32, #tpu.memory_space<vmem>>, vector<1x8x16x16xf32>
    tpu.vector_store %arg10[%c0_52, %c0_53, %c0_54, %c0_55], %77 {strides = array<i32>} : memref<1x8x16x16xf32, #tpu.memory_space<vmem>>, vector<1x8x16x16xf32>,
    return
  }
  func.func @transform_0(%arg0: i32, %arg1: i32) -> (i32, i32, i32, i32) {
    %c0_i32 = arith.constant 0 : i32
    %c0_i32_0 = arith.constant 0 : i32
    %c0_i32_1 = arith.constant 0 : i32
    return %arg0, %arg1, %c0_i32, %c0_i32_0 : i32, i32, i32, i32
  }
  func.func @transform_1(%arg0: i32, %arg1: i32) -> (i32, i32, i32, i32) {
    %c0_i32 = arith.constant 0 : i32
    %c0_i32_0 = arith.constant 0 : i32
    %c0_i32_1 = arith.constant 0 : i32
    return %arg0, %arg1, %c0_i32, %c0_i32_0 : i32, i32, i32, i32
  }
  func.func @transform_2(%arg0: i32, %arg1: i32) -> (i32, i32) {
    %c0_i32 = arith.constant 0 : i32
    %c0_i32_0 = arith.constant 0 : i32
    %c0_i32_1 = arith.constant 0 : i32
    return %c0_i32, %c0_i32_0 : i32, i32
  }
  func.func @transform_3(%arg0: i32, %arg1: i32) -> (i32, i32) {
    %c0_i32 = arith.constant 0 : i32
    %c0_i32_0 = arith.constant 0 : i32
    %c0_i32_1 = arith.constant 0 : i32
    return %c0_i32, %c0_i32_0 : i32, i32
  }
  func.func @transform_4(%arg0: i32, %arg1: i32) -> (i32, i32, i32) {
    %c0_i32 = arith.constant 0 : i32
    %c0_i32_0 = arith.constant 0 : i32
    %c0_i32_1 = arith.constant 0 : i32
    %c0_i32_2 = arith.constant 0 : i32
    return %c0_i32, %c0_i32_0, %c0_i32_1 : i32, i32, i32
  }
  func.func @transform_5(%arg0: i32, %arg1: i32) -> (i32, i32) {
    %c0_i32 = arith.constant 0 : i32
    %c0_i32_0 = arith.constant 0 : i32
    %c0_i32_1 = arith.constant 0 : i32
    return %c0_i32, %c0_i32_0 : i32, i32
  }
  func.func @transform_6(%arg0: i32, %arg1: i32) -> (i32, i32) {
    %c0_i32 = arith.constant 0 : i32
    %c0_i32_0 = arith.constant 0 : i32
    %c0_i32_1 = arith.constant 0 : i32
    return %c0_i32, %c0_i32_0 : i32, i32
  }
  func.func @transform_7(%arg0: i32, %arg1: i32) -> (i32, i32) {
    %c0_i32 = arith.constant 0 : i32
    %c0_i32_0 = arith.constant 0 : i32
    %c0_i32_1 = arith.constant 0 : i32
    return %c0_i32, %c0_i32_0 : i32, i32
  }
  func.func @transform_8(%arg0: i32, %arg1: i32) -> (i32, i32, i32, i32) {
    %c0_i32 = arith.constant 0 : i32
    %c0_i32_0 = arith.constant 0 : i32
    %c0_i32_1 = arith.constant 0 : i32
    return %arg0, %arg1, %c0_i32, %c0_i32_0 : i32, i32, i32, i32
  }
}

</mosaic_0001>

<bundles_post_ra>
// kernel: tpu_custom_call.1
= control target key start
LH: loop header
LB: loop body
LE: loop exit
PB: predicated region body
PF: predicated region fallthrough
CT: control target
= control target key end

     0   :  { %s4652_s0 = inlined_call_operand.hbm [shape: f32[2,16,16,16], index: 0, kind: input, shape index: {}]   ;;  %s4653_s1 = inlined_call_operand.hbm [shape: f32[2,4,16,16], index: 1, kind: input, shape index: {}]   ;;  %s4654_s2 = inlined_call_operand.vmem [shape: bf16[16,128], index: 2, kind: input, shape index: {}]   ;;  %s4655_s3 = inlined_call_operand.vmem [shape: f32[1,128], index: 3, kind: input, shape index: {}]   ;;  %s4656_s4 = inlined_call_operand.hbm [shape: bf16[3,384,128], index: 4, kind: input, shape index: {}]   ;;  %s4657_s5 = inlined_call_operand.vmem [shape: f32[1,128], index: 5, kind: input, shape index: {}]   ;;  %s4658_s6 = inlined_call_operand.vmem [shape: bf16[128,16], index: 6, kind: input, shape index: {}]   ;;  %s4659_s7 = inlined_call_operand.vmem [shape: f32[1,16], index: 7, kind: input, shape index: {}]   ;;  %s4660_s8 = inlined_call_operand.hbm [shape: f32[2,16,16,16], index: 8, kind: output, shape index: {}]  }
   0x1   :  { %4670 = sst [smem:[#allocation22_spill]] %s4655_s3 }
   0x2   :  { %4671 = sst [smem:[#allocation23_spill]] %s4656_s4 }
   0x3   :  { %4672 = sst [smem:[#allocation24_spill]] %s4657_s5 }
   0x4   :  { %4673 = sst [smem:[#allocation25_spill]] %s4658_s6 }
   0x5   :  { %4674 = sst [smem:[#allocation26_spill]] %s4659_s7 }
   0x6   :  { %4675 = sst [smem:[#allocation27_spill]] %s4660_s8 }
   0x7   :  { %13 = vsyncpa [#allocation4], 0 }
   0x8   :  { %15 = vsyncpa [#allocation4 + $0x1], 0 }
   0x9   :  { %16 = vsyncpa [#allocation7], 0 }
   0xa   :  { %18 = vsyncpa [#allocation7 + $0x1], 0 }
   0xb   :  { %19 = vsyncpa [#allocation5], 0 }
   0xc   :  { %21 = vsyncpa [#allocation5 + $0x1], 0  ;;  %s4063_s27 = smov 0   ;;  %s4065_s28 = smov 0  }
   0xd   :  { %s4067_s29 = smov 0   ;;  %s4069_s30 = smov 0  }
   0xe   :  { %s4071_s9 = smov 0   ;;  %s4073_s10 = smov 0  }
   0xf   :  { %s4075_s11 = smov 0   ;;  %s4077_s12 = smov 0  }
  0x10 LB: > { %4676 = sst [smem:[#allocation14_spill]] %s3981_s27  ;;  %s4104_s13 = sadd.s32 4294967295, %s4009_s12   ;;  %s4009_s12 = sphi %s4077_s12, %s27_s12   ;;  %s4005_s11 = sphi %s4075_s11, %s4717_s11   ;;  %s4001_s10 = sphi %s4073_s10, %s4716_s10   ;;  %s3997_s9 = sphi %s4071_s9, %s4715_s9   ;;  %s3993_s30 = sphi %s4069_s30, %s4714_s30   ;;  %s3989_s29 = sphi %s4067_s29, %s4709_s29   ;;  %s3985_s28 = sphi %s4065_s28, %s4713_s28   ;;  %s3981_s27 = sphi %s4063_s27, %s4712_s27  }
  0x11   : > { %4677 = sst [smem:[#allocation15_spill]] %s3989_s29  ;;  %s2874_s14 = sadd.s32 4294967294, %s4009_s12  }
  0x12   : > { %4678 = sst [smem:[#allocation16_spill]] %s3997_s9  ;;  %p61_p0 = scmp.ne.s32.totalorder %s3985_s28, %s3981_s27 }
  0x13   : > { %p62_p1 = scmp.eq.s32.totalorder %s4104_s13, 0  ;;  %p241_p2 = scmp.eq.s32.totalorder %s4104_s13, 3 }
  0x14   : > { %p247_p3 = scmp.eq.s32.totalorder %s2874_s14, 3  ;;  %p2875_p5 = scmp.ge.s32.totalorder %s4009_s12, 1 }
  0x15   : > { %p4113_p4 = por %p62_p1, %p61_p0  ;;  %p254_p7 = scmp.lt.s32.totalorder %s4009_s12, 5 }
  0x16   : > { %p4118_p6 = por %p247_p3, %p61_p0  ;;  %s4682_s4 = sld [smem:[#allocation23_spill]] }
  0x17   : > { %p4126_p8 = pnand %p2875_p5, %p254_p7  ;;  %s4011_s21 = smov [#allocation8]  }
  0x18   : > { %s4680_s16 = scalar_select %p4118_p6, 1, 0 }
  0x19   : > { %p3704_p9 = pneg %p4126_p8  ;;  %s273_s22 = sshll.u32 %s4011_s21, 4  ;;  %s274_s22 = int_to_ptr.vmem [resolvable:$true] %s273_s22 }
  0x1a   : > { %4681 = sst [smem:[#allocation17_spill]] %s4680_s16  ;;  %s4012_s23 = smov 64  }
  0x1b   : > { %p3705_p10 = pnand %p3704_p9, %p62_p1  ;;  %s4013_s24 = smov 4  }
  0x1c   : > { %s271_s19 = sshll.u32 %s4682_s4, 4  ;;  %s36_s25 = sadd.s32 1, %s4001_s10  ;;  %s272_s19 = int_to_ptr.hbm [resolvable:$true] %s271_s19 }
  0x1d   : > { %3707 = dma.hbm_to_vmem [thread:$0]  (!%p3705_p10), %s272_s19, 9216, %s274_s22, [#allocation7], %s4012_s23, %s4012_s23, %s4013_s24  }
  0x1e   : > { %p37_p11 = scmp.ge.s32.totalorder %s36_s25, 2  ;;  %s39_s26 = sadd.s32 1, %s4005_s11 }
  0x1f   : > { %s48_s14 = sadd.s32 1, %s3989_s29  ;;  %p55_p12 = scmp.ne.s32.totalorder %s3989_s29, %s3985_s28 }
  0x20   : > { %s4719_s25 = smov (%p37_p11, %s36_s25), 0  ;;  %s4721_s26 = smov (!%p37_p11, %s39_s26), %s4005_s11 }
  0x21   : > { %4684 = sst [smem:[#allocation18_spill]] %s4719_s25  ;;  %s44_s17 = ssub.s32 %s4001_s10, %s4719_s25 }
  0x22   : > { %p56_p13 = scmp.eq.s32.totalorder %s4009_s12, 0  ;;  %p41_p0 = scmp.ge.s32.totalorder %s4721_s26, 2 }
  0x23   : > { %p4147_p3 = por %p241_p2, %p55_p12  ;;  %p3720_p7 = scmp.lt.s32.totalorder %s4009_s12, 4 }
  0x24   : > { %p4151_p5 = por %p56_p13, %p55_p12  ;;  %s4723_s26 = smov (%p41_p0, %s4721_s26), 0 }
  0x25   : > { %s4685_s18 = scalar_select %p4147_p3, 1, 0 }
  0x26   : > { %4688 = sst [smem:[#allocation20_spill]] %s4723_s26  ;;  %s296_s21 = sand.u32 1, %s3989_s29  }
  0x27   : > { %4686 = sst [smem:[#allocation19_spill]] %s4685_s18  ;;  %s3522_s22 = sshll.u32 %s4001_s10, 4 }
  0x28   : > { %s43_s23 = ssub.s32 %s4005_s11, %s4723_s26  ;;  %s2878_s4 = sshll.u32 %s296_s21, 7 }
  0x29   : > { %s45_s24 = sor.u32 %s44_s17, %s43_s23  ;;  %s2881_s25 = sshll.u32 %s4005_s11, 5 }
  0x2a   : > { %p46_p9 = scmp.eq.s32.totalorder %s45_s24, 0  ;;  %s300_s16 = scalar_lea.vmem [#allocation3], %s2878_s4 }
  0x2b   : > { %s311_s27 = sshll.u32 %s300_s16, 4  ;;  %s306_s8 = sadd.s32 %s3522_s22, %s2881_s25  ;;  %s312_s27 = int_to_ptr.vmem [resolvable:$true] %s311_s27 }
  0x2c   : > { %s4164_s18 = scalar_select %p46_p9, %s3989_s29, %s48_s14  }
  0x2d   : > { %s2882_s9 = sshll.u32 %s306_s8, 3  ;;  %p4170_p2 = pnand %p3720_p7, %p4151_p5 }
  0x2e   : > { %4689 = sst [smem:[#allocation21_spill]] %s4164_s18  ;;  %s308_s24 = scalar_lea.hbm %s4652_s0, %s2882_s9 }
  0x2f   : > { %s309_s4 = sshll.u32 %s308_s24, 4  ;;  %s297_s16 = scalar_lea.sflag [#allocation4], %s296_s21  ;;  %s310_s4 = int_to_ptr.hbm [resolvable:$true] %s309_s4 }
  0x30   : > { %s4014_s26 = smov 128   ;;  %s4015_s14 = smov 8  }
  0x31   : > { %3711 = dma.hbm_to_vmem [thread:$0]  (!%p4170_p2), %s310_s4, 2048, %s312_s27, %s297_s16, %s4014_s26, %s4014_s26, %s4015_s14  }
  0x32   : > { %s2883_s8 = sshll.u32 %s296_s21, 5  ;;  %s321_s25 = sand.u32 1, %s4009_s12  }
  0x33   : > { %s3523_s19 = sshll.u32 %s4001_s10, 2  ;;  %s2886_s22 = sshll.u32 %s4005_s11, 3 }
  0x34   : > { %s331_s18 = sadd.s32 %s3523_s19, %s2886_s22  ;;  %s325_s29 = scalar_lea.vmem [#allocation6], %s2883_s8 }
  0x35   : > { %s336_s5 = sshll.u32 %s325_s29, 4  ;;  %s2887_s6 = sshll.u32 %s331_s18, 3  ;;  %s337_s5 = int_to_ptr.vmem [resolvable:$true] %s336_s5 }
  0x36   : > { %s333_s9 = scalar_lea.hbm %s4653_s1, %s2887_s6  ;;  %s322_s24 = scalar_lea.sflag [#allocation7], %s321_s25 }
  0x37   : > { %s334_s23 = sshll.u32 %s333_s9, 4  ;;  %348 = sbr.rel (%p4126_p8) target bundleno = 904 (0x388), region = 52  ;;  %s335_s23 = int_to_ptr.hbm [resolvable:$true] %s334_s23 }
  0x38   : > { %3714 = dma.hbm_to_vmem [thread:$0]  (!%p4170_p2), %s335_s23, 512, %s337_s5, %s322_s24, %s4014_s26, %s4014_s26, %s4015_s14  }
  0x39   : > { %s4190_s27 = sand.u32 (!%p4126_p8), 1, %s3985_s28  }
  0x3a   : > { %s2889_s29 = sshll.u32 (!%p4126_p8), %s4190_s27, 7  ;;  %s351_s18 = scalar_lea.sflag (!%p4126_p8), [#allocation4], %s4190_s27 }
  0x3b   : > { %s4196_s3 = scalar_lea.vmem (!%p4126_p8), [#allocation3], %s2889_s29 }
  0x3c   : > { %3964 = dma.done.wait (%p4113_p4), %s351_s18, 2048  }
  0x3d   : > { %3966 = vsyncadd (%p4113_p4), %s351_s18, 4294965248  ;;  %s360_s5 = sand.u32 1, %s4104_s13   ;;  %s2890_s6 = sshll.u32 %s4190_s27, 5 }
  0x3e   : > { %s361_s7 = scalar_lea.sflag [#allocation7], %s360_s5  ;;  %s4204_s20 = scalar_lea.vmem [#allocation6], %s2890_s6 }
  0x3f   : > { %3968 = dma.done.wait (%p4113_p4), %s361_s7, 512  }
  0x40   : > { %3970 = vsyncadd (%p4113_p4), %s361_s7, 4294966784 }
  0x41   : > { %3972 = dma.done.wait (%p62_p1), [#allocation7], 9216  }
  0x42   : > { %3974 = vsyncadd (%p62_p1), [#allocation7], 4294958080  ;;  %v3524_v0 = vld [vmem:[%s4654_s2] sm:$0xff]  ;;  %v412_v1 = vld [vmem:[%s4196_s3] sm:$0xff]  ;;  %vm448_vm0 = vcmask 130048   ;;  %p601_p1 = scmp.gt.s32.totalorder %s3993_s30, 0 }
  0x43   : > { %v413_v2 = vld [vmem:[%s4196_s3 + $0x8] sm:$0xff]  ;;  %v554_v4 = vld [vmem:[%s4204_s20] sm:$0xff]  ;;  %480 = vmatpush.bf16.msra.mxu0 %v3524_v0  ;;  %585 = vmatpush.bf16.msra.mxu1 %v3524_v0  ;;  %v414_v11 = vld [vmem:[%s4196_s3 + $0x10] sm:$0xff]  ;;  %s4691_s4 = sld [smem:[#allocation22_spill]]  ;;  %vm747_vm2 = vcmask 1040384   ;;  %vm900_vm4 = vcmask 1047552  }
  0x44   : > { %v428_v3 = vpack.c.bf16 %v413_v2, %v412_v1  ;;  %v555_v5 = vld [vmem:[%s4204_s20 + $0x8] sm:$0xff]  ;;  %v558_v6 = vpack.c.bf16 %v554_v4, %v554_v4  ;;  %v415_v12 = vld [vmem:[%s4196_s3 + $0x18] sm:$0xff]  ;;  %v416_v14 = vld [vmem:[%s4196_s3 + $0x20] sm:$0xff]  ;;  %s602_s16 = scalar_select %p601_p1, 1, 0 }
  0x45   : > { %v559_v7 = vpack.c.bf16 %v555_v5, %v555_v5  ;;  %v429_v13 = vpack.c.bf16 %v415_v12, %v414_v11  ;;  %v417_v15 = vld [vmem:[%s4196_s3 + $0x28] sm:$0xff]  ;;  %v418_v17 = vld [vmem:[%s4196_s3 + $0x30] sm:$0xff]  ;;  %v419_v18 = vld [vmem:[%s4196_s3 + $0x38] sm:$0xff]  ;;  %vm748_vm3 = vsmask.f32 256  ;;  %p609_p4 = scmp.lt.s32.totalorder %s3993_s30, 1 }
  0x46   : > { %v566_v8 = vunpack.c.l.b16 %v558_v6  ;;  %2897 = vmatmul.msk.bf16.vlgmr.msra.gmra.mxu0 %vm448_vm0, %v428_v3  ;;  %v430_v16 = vpack.c.bf16 %v417_v15, %v416_v14  ;;  %v431_v19 = vpack.c.bf16 %v419_v18, %v418_v17  ;;  %v420_v20 = vld [vmem:[%s4196_s3 + $0x40] sm:$0xff]  ;;  %v421_v21 = vld [vmem:[%s4196_s3 + $0x48] sm:$0xff]  ;;  %v422_v23 = vld [vmem:[%s4196_s3 + $0x50] sm:$0xff]  ;;  %v603_v53 = vstv %s602_s16  ;;  %s4700_s19 = sld [smem:[#allocation25_spill]]  ;;  %s4543_s17 = scalar_lea.vmem [#allocation9], %s2889_s29 }
  0x47   : > { %v567_v9 = vunpack.c.l.b16 %v559_v7  ;;  %v432_v22 = vpack.c.bf16 %v421_v21, %v420_v20  ;;  %v423_v24 = vld [vmem:[%s4196_s3 + $0x58] sm:$0xff]  ;;  %v424_v26 = vld [vmem:[%s4196_s3 + $0x60] sm:$0xff]  ;;  %v425_v27 = vld [vmem:[%s4196_s3 + $0x68] sm:$0xff]  ;;  %vm4255_vm1 = vcmp.eq.s32.totalorder %v603_v53, 1  ;;  %vm901_vm5 = vsmask.f32 7424 }
  0x48   : > { %v433_v25 = vpack.c.bf16 %v423_v24, %v422_v23  ;;  %v434_v28 = vpack.c.bf16 %v425_v27, %v424_v26  ;;  %v3604_v29 = vld [vmem:[#allocation8 + $0xf8] sm:$0xff]  ;;  %v426_v30 = vld [vmem:[%s4196_s3 + $0x70] sm:$0xff]  ;;  %v3602_v36 = vld [vmem:[#allocation8 + $0xe8] sm:$0xff]  ;;  %s4321_s14 = scalar_select %p609_p4, 1, 0 }
  0x49   : > { %v570_v10 = vpack.c.b16 %v567_v9, %v566_v8  ;;  %v427_v31 = vld [vmem:[%s4196_s3 + $0x78] sm:$0xff]  ;;  %1437 = vmatpush.bf16.msrb.mxu1 %v3604_v29  ;;  %3678 = vmatpush.bf16.msra.mxu2 %v3604_v29  ;;  %v3603_v33 = vld [vmem:[#allocation8 + $0xf0] sm:$0xff]  ;;  %v3554_v37 = vld [vmem:[#allocation8 + $0x28] sm:$0xff]  ;;  %s4702_s22 = sld [smem:[#allocation26_spill]]  ;;  %s3677_s9 = sshll.u32 %s3993_s30, 4 }
  0x4a   : > { %v3556_v32 = vld [vmem:[#allocation8 + $0x38] sm:$0xff]  ;;  %v435_v34 = vpack.c.bf16 %v427_v31, %v426_v30  ;;  %v3555_v35 = vld [vmem:[#allocation8 + $0x30] sm:$0xff]  ;;  %v3601_v38 = vld [vmem:[#allocation8 + $0xe0] sm:$0xff]  ;;  %s4703_s29 = sld [smem:[#allocation16_spill]]  ;;  %s2745_s26 = sshll.u32 %s4543_s17, 4  ;;  %s2746_s26 = int_to_ptr.vmem [resolvable:$true] %s2745_s26 }
  0x4b   : > { %2905 = vmatmul.msk.bf16.vlgmr.msra.gmra.mxu1 %vm448_vm0, %v570_v10  ;;  %1856 = vmatpush.bf16.msrb.mxu0 %v3556_v32  ;;  %v556_v39 = vld [vmem:[%s4204_s20 + $0x10] sm:$0xff]  ;;  %v557_v40 = vld [vmem:[%s4204_s20 + $0x18] sm:$0xff]  ;;  %v3553_v41 = vld [vmem:[#allocation8 + $0x20] sm:$0xff]  ;;  %s4704_s7 = sld [smem:[#allocation27_spill]]  ;;  %s2730_s13 = scalar_lea.sflag [#allocation5], %s4190_s27 }
  0x4c   : > { %v560_v42 = vpack.c.bf16 %v556_v39, %v556_v39  ;;  %v561_v43 = vpack.c.bf16 %v557_v40, %v557_v40  ;;  %v4250_v46 = vld [vmem:[%s4691_s4] ss:$0 sm:$0xff]  ;;  %v3600_v48 = vld [vmem:[#allocation8 + $0xd8] sm:$0xff]  ;;  %v3598_v63 = vld [vmem:[#allocation8 + $0xc8] sm:$0xff] }
  0x4d   : > { %1438 = vmatpush.bf16.msrb.mxu1 %v3603_v33  ;;  %3679 = vmatpush.bf16.msra.mxu2 %v3603_v33  ;;  %v3612_v49 = vld [vmem:[#allocation8 + $0x138] sm:$0xff]  ;;  %v3599_v54 = vld [vmem:[#allocation8 + $0xd0] sm:$0xff]  ;;  %v3610_v0 = vld [vmem:[#allocation8 + $0x128] sm:$0xff] }
  0x4e   : > { %v568_v44 = vunpack.c.l.b16 %v560_v42  ;;  %v569_v45 = vunpack.c.l.b16 %v561_v43  ;;  %3686 = vmatpush.bf16.msra.mxu3 %v3612_v49  ;;  %v3552_v52 = vld [vmem:[#allocation8 + $0x18] sm:$0xff]  ;;  %v3611_v57 = vld [vmem:[#allocation8 + $0x130] sm:$0xff]  ;;  %v3550_v5 = vld [vmem:[#allocation8 + $0x8] sm:$0xff] }
  0x4f   : > { %1857 = vmatpush.bf16.msrb.mxu0 %v3555_v35  ;;  %v3551_v61 = vld [vmem:[#allocation8 + $0x10] sm:$0xff]  ;;  %v3597_v6 = vld [vmem:[#allocation8 + $0xc0] sm:$0xff]  ;;  %vm4266_vm6 = vmand %vm747_vm2, %vm748_vm3 }
  0x50   : > { %v571_v47 = vpack.c.b16 %v569_v45, %v568_v44  ;;  %v3609_v9 = vld [vmem:[#allocation8 + $0x120] sm:$0xff]  ;;  %v3607_v27 = vld [vmem:[#allocation8 + $0x110] sm:$0xff]  ;;  %vm4271_vm7 = vmand %vm900_vm4, %vm901_vm5  ;;  %s3518_s23 = sshll.u32 %s4703_s29, 5 }
  0x51   : > { %1439 = vmatpush.bf16.msrb.mxu1 %v3602_v36  ;;  %3680 = vmatpush.bf16.msra.mxu2 %v3602_v36  ;;  %v3549_v12 = vld [vmem:[#allocation8] sm:$0xff]  ;;  %s2742_s24 = sadd.s32 %s3677_s9, %s3518_s23  ;;  %s3923_s8 = scalar_lea.hbm %s4704_s7, 512 }
  0x52   : > { %3687 = vmatpush.bf16.msra.mxu3 %v3611_v57  ;;  %s3519_s18 = sshll.u32 %s2742_s24, 3 }
  0x53   : > { %1858 = vmatpush.bf16.msrb.mxu0 %v3554_v37  ;;  %s2744_s30 = scalar_lea.hbm %s4704_s7, %s3519_s18 }
  0x54   : > { %s2747_s21 = sshll.u32 %s2744_s30, 4  ;;  %s2748_s21 = int_to_ptr.hbm [resolvable:$true] %s2747_s21 }
  0x55   : > { %1440 = vmatpush.bf16.msrb.mxu1 %v3601_v38  ;;  %3681 = vmatpush.bf16.msra.mxu2 %v3601_v38  ;;  %v3606_v38 = vld [vmem:[#allocation8 + $0x108] sm:$0xff]  ;;  %s3917_s15 = sshra.s32 %s2748_s21, 4  ;;  %s3918_s15 = int_to_ptr.hbm [resolvable:$true] %s3917_s15 }
  0x56   : > { %2898 = vmatmul.msk.bf16.gmra.mxu0 %vm448_vm0, %v429_v13  ;;  %3688 = vmatpush.bf16.msra.mxu3 %v3610_v0  ;;  %s3919_s4 = scalar_lea.hbm %s3918_s15, 128  ;;  %p3924_p12 = scmp.lt.s32.totalorder %s3918_s15, %s4704_s7 }
  0x57   : > { %1859 = vmatpush.bf16.msrb.mxu0 %v3553_v41  ;;  %p3920_p8 = scmp.ne.s32.totalorder %s3918_s15, %s3919_s4  ;;  %p3925_p13 = scmp.lt.s32.totalorder %s3923_s8, %s3919_s4 }
  0x59   : > { %1441 = vmatpush.bf16.msrb.mxu1 %v3600_v48  ;;  %3682 = vmatpush.bf16.msra.mxu2 %v3600_v48  ;;  %p3921_p10 = pnand %p3920_p8, %p4147_p3  ;;  %p3926_p0 = por %p3925_p13, %p3924_p12 }
  0x5a   : > { %3689 = vmatpush.bf16.msra.mxu3 %v3609_v9 }
  0x5b   : > { %2906 = vmatmul.msk.bf16.gmra.mxu1 %vm448_vm0, %v571_v47  ;;  %1860 = vmatpush.bf16.msrb.mxu0 %v3552_v52  ;;  %v3605_v52 = vld [vmem:[#allocation8 + $0x100] sm:$0xff]  ;;  %p3922_p11 = pneg %p3921_p10 }
  0x5d   : > { %1442 = vmatpush.bf16.msrb.mxu1 %v3599_v54  ;;  %3683 = vmatpush.bf16.msra.mxu2 %v3599_v54  ;;  %p3927_p5 = pnand %p3926_p0, %p3922_p11 }
  0x5f   : > { %1861 = vmatpush.bf16.msrb.mxu0 %v3551_v61 }
  0x61   : > { %1443 = vmatpush.bf16.msrb.mxu1 %v3598_v63  ;;  %3684 = vmatpush.bf16.msra.mxu2 %v3598_v63 }
  0x63   : > { %1862 = vmatpush.bf16.msrb.mxu0 %v3550_v5 }
  0x65   : > { %1444 = vmatpush.bf16.msrb.mxu1 %v3597_v6  ;;  %3685 = vmatpush.bf16.msra.mxu2 %v3597_v6 }
  0x66   : > { %2899 = vmatmul.msk.bf16.gmra.mxu0 %vm448_vm0, %v430_v16  ;;  %v3608_v16 = vld [vmem:[#allocation8 + $0x118] sm:$0xff] }
  0x67   : > { %1863 = vmatpush.bf16.msrb.mxu0 %v3549_v12  ;;  %3690 = vmatpush.bf16.msra.mxu3 %v3608_v16 }
  0x69   : > { %1486 = vmatpush.bf16.msra.mxu1 %v3612_v49 }
  0x6b   : > { %3691 = vmatpush.bf16.msra.mxu3 %v3607_v27 }
  0x6d   : > { %1487 = vmatpush.bf16.msra.mxu1 %v3611_v57 }
  0x6f   : > { %3692 = vmatpush.bf16.msra.mxu3 %v3606_v38 }
  0x71   : > { %1488 = vmatpush.bf16.msra.mxu1 %v3610_v0 }
  0x73   : > { %3693 = vmatpush.bf16.msra.mxu3 %v3605_v52 }
  0x75   : > { %1489 = vmatpush.bf16.msra.mxu1 %v3609_v9 }
  0x76   : > { %2900 = vmatmul.msk.bf16.gmra.mxu0 %vm448_vm0, %v431_v19 }
  0x79   : > { %1490 = vmatpush.bf16.msra.mxu1 %v3608_v16 }
  0x7d   : > { %1491 = vmatpush.bf16.msra.mxu1 %v3607_v27 }
  0x81   : > { %1492 = vmatpush.bf16.msra.mxu1 %v3606_v38 }
  0x85   : > { %1493 = vmatpush.bf16.msra.mxu1 %v3605_v52 }
  0x86   : > { %2901 = vmatmul.msk.bf16.gmra.mxu0 %vm448_vm0, %v432_v22 }
  0x96   : > { %2902 = vmatmul.msk.bf16.gmra.mxu0 %vm448_vm0, %v433_v25 }
  0xa6   : > { %2903 = vmatmul.msk.bf16.gmra.mxu0 %vm448_vm0, %v434_v28 }
  0xb6   : > { %2904 = vmatmul.msk.bf16.gmra.mxu0 %vm448_vm0, %v435_v34 }
  0xc3   : > { %v482_v50 = vpop.f32.mrf.mxu0 }
  0xc4   : > { %v483_v51 = vadd.f32 %v4250_v46, %v482_v50 }
  0xc6   : > { %v522_v55 = vmax.f32 %v483_v51, 0.0 }
  0xc8   : > { %v587_v56 = vpop.f32.mrf.mxu1  ;;  %v538_v59 = vpack.c.bf16 %v522_v55, %v522_v55 }
  0xc9   : > { %v588_v58 = vadd.f32 %v4250_v46, %v587_v56 }
  0xca   : > { %852 = vst [vmem:[#allocation2 + $0x1c] sm:$0xf] %v538_v59  ;;  %v639_v14 = vunpack.c.l.b16 %v538_v59 }
  0xcb   : > { %v597_v62 = vmax.f32 %v588_v58, 0.0  ;;  %v484_v2 = vpop.f32.mrf.mxu0 }
  0xcc   : > { %v485_v4 = vadd.f32 %v4250_v46, %v484_v2 }
  0xcd   : > { %v605_v1 = vsel %vm4255_vm1, %v597_v62, 0.0 }
  0xce   : > { %v607_v3 = vpack.c.bf16 %v605_v1, %v605_v1  ;;  %v523_v7 = vmax.f32 %v485_v4, 0.0 }
  0xd0   : > { %850 = vst [vmem:[#allocation2 + $0x4] sm:$0xf] %v607_v3  ;;  %v589_v8 = vpop.f32.mrf.mxu1  ;;  %v539_v11 = vpack.c.bf16 %v523_v7, %v523_v7  ;;  %v637_v19 = vunpack.c.l.b16 %v607_v3 }
  0xd1   : > { %v590_v10 = vadd.f32 %v4250_v46, %v589_v8 }
  0xd2   : > { %v640_v15 = vunpack.c.l.b16 %v539_v11  ;;  %853 = vst [vmem:[#allocation2 + $0x28] sm:$0xf] %v539_v11 }
  0xd3   : > { %v598_v13 = vmax.f32 %v590_v10, 0.0  ;;  %v487_v18 = vpop.f32.mrf.mxu0 }
  0xd4   : > { %v658_v20 = vpack.c.b16 %v640_v15, %v639_v14  ;;  %v488_v22 = vadd.f32 %v4250_v46, %v487_v18 }
  0xd5   : > { %v606_v17 = vsel %vm4255_vm1, %v598_v13, 0.0 }
  0xd6   : > { %v608_v21 = vpack.c.bf16 %v606_v17, %v606_v17  ;;  %v675_v23 = vshrl.u32 %v658_v20, 16  ;;  %v678_v24 = vshll.u32 %v658_v20, 16  ;;  %v524_v26 = vmax.f32 %v488_v22, 0.0 }
  0xd7   : > { %v3525_v29 = vld [vmem:[#allocation2 + $0x4] sm:$0xf] }
  0xd8   : > { %v638_v25 = vunpack.c.l.b16 %v608_v21  ;;  %851 = vst [vmem:[#allocation2 + $0x10] sm:$0xf] %v608_v21  ;;  %v677_v28 = vrot.slane %v675_v23, 7  ;;  %v872_v30 = vrot.slane %v678_v24, 1  ;;  %v540_v32 = vpack.c.bf16 %v524_v26, %v524_v26 }
  0xda   : > { %v657_v31 = vpack.c.b16 %v638_v25, %v637_v19  ;;  %v680_v34 = vor.u32 %v678_v24, %v677_v28  ;;  %v873_v35 = vor.u32 %v872_v30, %v675_v23  ;;  %854 = vst [vmem:[#allocation2 + $0x34] sm:$0xf] %v540_v32  ;;  %v641_v6 = vunpack.c.l.b16 %v540_v32 }
  0xdb   : > { %v489_v39 = vpop.f32.mrf.mxu0 }
  0xdc   : > { %v668_v36 = vshrl.u32 %v657_v31, 16  ;;  %v671_v37 = vshll.u32 %v657_v31, 16  ;;  %v751_v40 = vsel %vm4266_vm6, 0, %v680_v34  ;;  %v904_v41 = vsel %vm4271_vm7, %v873_v35, 0 }
  0xdd   : > { %v772_v44 = vunpack.c.l.b16 %v751_v40  ;;  %v773_v45 = vunpack.c.h.b16 %v751_v40  ;;  %v925_v47 = vunpack.c.l.b16 %v904_v41  ;;  %v926_v48 = vunpack.c.h.b16 %v904_v41 }
  0xde   : > { %v670_v42 = vrot.slane %v668_v36, 7  ;;  %v870_v43 = vrot.slane %v671_v37, 1  ;;  %v490_v51 = vadd.f32 %v4250_v46, %v489_v39  ;;  %v3620_v39 = vld [vmem:[#allocation8 + $0x178] sm:$0xff] }
  0xdf   : > { %v792_v53 = vpack.c.b16 %v772_v44, %v772_v44  ;;  %v793_v54 = vpack.c.b16 %v773_v45, %v773_v45  ;;  %v945_v55 = vpack.c.b16 %v925_v47, %v925_v47  ;;  %v946_v56 = vpack.c.b16 %v926_v48, %v926_v48  ;;  %v3619_v47 = vld [vmem:[#allocation8 + $0x170] sm:$0xff]  ;;  %v3103_v33 = vld [vmem:[#allocation2 + $0xc] sm:$0xf0] }
  0xe0   : > { %v673_v49 = vor.u32 %v671_v37, %v670_v42  ;;  %v871_v50 = vor.u32 %v870_v43, %v668_v36  ;;  %v525_v59 = vmax.f32 %v490_v51, 0.0 }
  0xe1   : > { %832 = vst [vmem:[#allocation2 + $0x18] sm:$0xf] %v792_v53 }
  0xe2   : > { %v750_v57 = vsel %vm4266_vm6, 0, %v673_v49  ;;  %v903_v58 = vsel %vm4271_vm7, %v871_v50, 0  ;;  %833 = vst [vmem:[#allocation2 + $0x24] sm:$0xf] %v793_v54  ;;  %v541_v0 = vpack.c.bf16 %v525_v59, %v525_v59 }
  0xe3   : > { %v770_v60 = vunpack.c.l.b16 %v750_v57  ;;  %v771_v61 = vunpack.c.h.b16 %v750_v57  ;;  %v923_v62 = vunpack.c.l.b16 %v903_v58  ;;  %v924_v63 = vunpack.c.h.b16 %v903_v58  ;;  %985 = vst [vmem:[#allocation2 + $0x20] sm:$0xf] %v945_v55  ;;  %v492_v4 = vpop.f32.mrf.mxu0 }
  0xe4   : > { %986 = vst [vmem:[#allocation2 + $0x2c] sm:$0xf] %v946_v56  ;;  %v642_v7 = vunpack.c.l.b16 %v541_v0  ;;  %v493_v8 = vadd.f32 %v4250_v46, %v492_v4  ;;  %v3618_v56 = vld [vmem:[#allocation8 + $0x168] sm:$0xff] }
  0xe5   : > { %v790_v1 = vpack.c.b16 %v770_v60, %v770_v60  ;;  %v791_v2 = vpack.c.b16 %v771_v61, %v771_v61  ;;  %v943_v3 = vpack.c.b16 %v923_v62, %v923_v62  ;;  %v944_v5 = vpack.c.b16 %v924_v63, %v924_v63  ;;  %855 = vst [vmem:[#allocation2 + $0x40] sm:$0xf] %v541_v0 }
  0xe6   : > { %v659_v9 = vpack.c.b16 %v642_v7, %v641_v6  ;;  %v526_v10 = vmax.f32 %v493_v8, 0.0 }
  0xe7   : > { %830 = vst [vmem:[#allocation2] sm:$0xf] %v790_v1 }
  0xe8   : > { %831 = vst [vmem:[#allocation2 + $0xc] sm:$0xf] %v791_v2  ;;  %v682_v11 = vshrl.u32 %v659_v9, 16  ;;  %v685_v12 = vshll.u32 %v659_v9, 16  ;;  %v542_v13 = vpack.c.bf16 %v526_v10, %v526_v10  ;;  %v2909_v14 = vld [vmem:[#allocation2 + $0x18] sm:$0xf] }
  0xe9   : > { %983 = vst [vmem:[#allocation2 + $0x8] sm:$0xf] %v943_v3  ;;  %v3574_v15 = vld [vmem:[#allocation2 + $0x20] sm:$0xf0]  ;;  %v3113_v63 = vld [vmem:[#allocation2 + $0x18] sm:$0xf] }
  0xea   : > { %984 = vst [vmem:[#allocation2 + $0x14] sm:$0xf] %v944_v5  ;;  %v684_v16 = vrot.slane %v682_v11, 7  ;;  %v874_v17 = vrot.slane %v685_v12, 1  ;;  %v2910_v18 = vor.u32 %v3574_v15, %v2909_v14  ;;  %v643_v41 = vunpack.c.l.b16 %v542_v13  ;;  %v3529_v0 = vld [vmem:[#allocation2 + $0x20] sm:$0xf0] }
  0xeb   : > { %856 = vst [vmem:[#allocation2 + $0x4c] sm:$0xf] %v542_v13  ;;  %v494_v19 = vpop.f32.mrf.mxu0  ;;  %v3617_v9 = vld [vmem:[#allocation8 + $0x160] sm:$0xff] }
  0xec   : > { %v687_v20 = vor.u32 %v685_v12, %v684_v16  ;;  %v875_v21 = vor.u32 %v874_v17, %v682_v11  ;;  %v495_v22 = vadd.f32 %v4250_v46, %v494_v19  ;;  %1445 = vmatmul.bf16.vlgmr.msrb.gmra.mxu1 %v2910_v18  ;;  %v3114_v11 = vor.u32 %v3529_v0, %v3113_v63  ;;  %v3616_v19 = vld [vmem:[#allocation8 + $0x158] sm:$0xff] }
  0xed   : > { %1535 = vmatpush.bf16.msrb.mxu1 %v3620_v39 }
  0xee   : > { %v3101_v23 = vld [vmem:[#allocation2] sm:$0xf]  ;;  %v752_v25 = vsel %vm4266_vm6, 0, %v687_v20  ;;  %v905_v26 = vsel %vm4271_vm7, %v875_v21, 0  ;;  %v527_v27 = vmax.f32 %v495_v22, 0.0 }
  0xef   : > { %v3526_v24 = vld [vmem:[#allocation2 + $0x8] sm:$0xf0]  ;;  %v774_v30 = vunpack.c.l.b16 %v752_v25  ;;  %v775_v31 = vunpack.c.h.b16 %v752_v25  ;;  %v927_v32 = vunpack.c.l.b16 %v905_v26  ;;  %v928_v34 = vunpack.c.h.b16 %v905_v26 }
  0xf0   : > { %v3102_v28 = vor.u32 %v3526_v24, %v3101_v23  ;;  %v543_v35 = vpack.c.bf16 %v527_v27, %v527_v27  ;;  %v3564_v23 = vld [vmem:[#allocation8 + $0x78] sm:$0xff]  ;;  %v3563_v27 = vld [vmem:[#allocation8 + $0x70] sm:$0xff] }
  0xf1   : > { %v794_v36 = vpack.c.b16 %v774_v30, %v774_v30  ;;  %v795_v37 = vpack.c.b16 %v775_v31, %v775_v31  ;;  %v947_v38 = vpack.c.b16 %v927_v32, %v927_v32  ;;  %v948_v40 = vpack.c.b16 %v928_v34, %v928_v34  ;;  %1536 = vmatpush.bf16.msrb.mxu1 %v3619_v47 }
  0xf2   : > { %1864 = vmatmul.bf16.vlgmr.msrb.gmra.mxu0 %v3102_v28  ;;  %v644_v42 = vunpack.c.l.b16 %v543_v35  ;;  %857 = vst [vmem:[#allocation2 + $0x58] sm:$0xf] %v543_v35  ;;  %v3579_v54 = vld [vmem:[#allocation2 + $0x4c] sm:$0xf]  ;;  %1905 = vmatpush.bf16.msrb.mxu2 %v3564_v23  ;;  %v3615_v28 = vld [vmem:[#allocation8 + $0x150] sm:$0xff] }
  0xf3   : > { %834 = vst [vmem:[#allocation2 + $0x30] sm:$0xf] %v794_v36  ;;  %v497_v43 = vpop.f32.mrf.mxu0  ;;  %v2911_v36 = vld [vmem:[#allocation2 + $0x24] sm:$0xf0] }
  0xf4   : > { %835 = vst [vmem:[#allocation2 + $0x3c] sm:$0xf] %v795_v37  ;;  %v660_v44 = vpack.c.b16 %v644_v42, %v643_v41  ;;  %v498_v45 = vadd.f32 %v4250_v46, %v497_v43  ;;  %v3573_v42 = vld [vmem:[#allocation2 + $0x1c] sm:$0xf] }
  0xf5   : > { %987 = vst [vmem:[#allocation2 + $0x38] sm:$0xf] %v947_v38  ;;  %1537 = vmatpush.bf16.msrb.mxu1 %v3618_v56 }
  0xf6   : > { %988 = vst [vmem:[#allocation2 + $0x44] sm:$0xf] %v948_v40  ;;  %v689_v48 = vshrl.u32 %v660_v44, 16  ;;  %v692_v49 = vshll.u32 %v660_v44, 16  ;;  %v528_v50 = vmax.f32 %v498_v45, 0.0  ;;  %1906 = vmatpush.bf16.msrb.mxu2 %v3563_v27  ;;  %v3614_v40 = vld [vmem:[#allocation8 + $0x148] sm:$0xff] }
  0xf8   : > { %v691_v51 = vrot.slane %v689_v48, 7  ;;  %v876_v52 = vrot.slane %v692_v49, 1  ;;  %v544_v53 = vpack.c.bf16 %v528_v50, %v528_v50 }
  0xf9   : > { %v2935_v55 = vld [vmem:[#allocation2 + $0x54] sm:$0xf0]  ;;  %1538 = vmatpush.bf16.msrb.mxu1 %v3617_v9 }
  0xfa   : > { %v694_v57 = vor.u32 %v692_v49, %v691_v51  ;;  %v877_v58 = vor.u32 %v876_v52, %v689_v48  ;;  %858 = vst [vmem:[#allocation2 + $0x64] sm:$0xf] %v544_v53  ;;  %v2921_v59 = vld [vmem:[#allocation2 + $0x30] sm:$0xf]  ;;  %v2938_v60 = vor.u32 %v3579_v54, %v2935_v55  ;;  %v645_v17 = vunpack.c.l.b16 %v544_v53 }
  0xfb   : > { %v499_v61 = vpop.f32.mrf.mxu0  ;;  %v3577_v62 = vld [vmem:[#allocation2 + $0x38] sm:$0xf0]  ;;  %v3125_v43 = vld [vmem:[#allocation2 + $0x30] sm:$0xf]  ;;  %v2914_v49 = vor.u32 %v3573_v42, %v2911_v36 }
  0xfc   : > { %v753_v1 = vsel %vm4266_vm6, 0, %v694_v57  ;;  %v906_v2 = vsel %vm4271_vm7, %v877_v58, 0  ;;  %v500_v3 = vadd.f32 %v4250_v46, %v499_v61  ;;  %v2922_v4 = vor.u32 %v3577_v62, %v2921_v59  ;;  %1504 = vmatmul.bf16.vlgmr.msra.gmra.mxu3 %v2938_v60  ;;  %v3532_v44 = vld [vmem:[#allocation2 + $0x38] sm:$0xf0]  ;;  %v3613_v59 = vld [vmem:[#allocation8 + $0x140] sm:$0xff] }
  0xfd   : > { %v776_v5 = vunpack.c.l.b16 %v753_v1  ;;  %v777_v6 = vunpack.c.h.b16 %v753_v1  ;;  %v929_v7 = vunpack.c.l.b16 %v906_v2  ;;  %v930_v8 = vunpack.c.h.b16 %v906_v2  ;;  %1539 = vmatpush.bf16.msrb.mxu1 %v3616_v19 }
  0xfe   : > { %v529_v10 = vmax.f32 %v500_v3, 0.0  ;;  %1450 = vmatmul.bf16.gmra.mxu1 %v2922_v4  ;;  %v3126_v58 = vor.u32 %v3532_v44, %v3125_v43 }
  0xff   : > { %v796_v12 = vpack.c.b16 %v776_v5, %v776_v5  ;;  %v797_v13 = vpack.c.b16 %v777_v6, %v777_v6  ;;  %v949_v14 = vpack.c.b16 %v929_v7, %v929_v7  ;;  %v950_v15 = vpack.c.b16 %v930_v8, %v930_v8  ;;  %v3562_v6 = vld [vmem:[#allocation8 + $0x68] sm:$0xff] }
 0x100   : > { %v545_v16 = vpack.c.bf16 %v529_v10, %v529_v10  ;;  %1907 = vmatpush.bf16.msrb.mxu2 %v3562_v6 }
 0x101   : > { %836 = vst [vmem:[#allocation2 + $0x48] sm:$0xf] %v796_v12  ;;  %1540 = vmatpush.bf16.msrb.mxu1 %v3615_v28  ;;  %v3582_v55 = vld [vmem:[#allocation2 + $0x64] sm:$0xf] }
 0x102   : > { %1869 = vmatmul.bf16.gmra.mxu0 %v3114_v11  ;;  %837 = vst [vmem:[#allocation2 + $0x54] sm:$0xf] %v797_v13  ;;  %v646_v18 = vunpack.c.l.b16 %v545_v16 }
 0x103   : > { %989 = vst [vmem:[#allocation2 + $0x50] sm:$0xf] %v949_v14  ;;  %v502_v20 = vpop.f32.mrf.mxu0 }
 0x104   : > { %990 = vst [vmem:[#allocation2 + $0x5c] sm:$0xf] %v950_v15  ;;  %v661_v21 = vpack.c.b16 %v646_v18, %v645_v17  ;;  %v503_v22 = vadd.f32 %v4250_v46, %v502_v20  ;;  %v2923_v15 = vld [vmem:[#allocation2 + $0x3c] sm:$0xf0]  ;;  %v3576_v20 = vld [vmem:[#allocation2 + $0x34] sm:$0xf] }
 0x105   : > { %859 = vst [vmem:[#allocation2 + $0x70] sm:$0xf] %v545_v16  ;;  %1541 = vmatpush.bf16.msrb.mxu1 %v3614_v40 }
 0x106   : > { %v696_v24 = vshrl.u32 %v661_v21, 16  ;;  %v699_v25 = vshll.u32 %v661_v21, 16  ;;  %v530_v26 = vmax.f32 %v503_v22, 0.0 }
 0x108   : > { %v698_v30 = vrot.slane %v696_v24, 7  ;;  %v878_v31 = vrot.slane %v699_v25, 1  ;;  %v546_v32 = vpack.c.bf16 %v530_v26, %v530_v26  ;;  %v2933_v34 = vld [vmem:[#allocation2 + $0x48] sm:$0xf]  ;;  %v2926_v26 = vor.u32 %v3576_v20, %v2923_v15 }
 0x109   : > { %v3580_v35 = vld [vmem:[#allocation2 + $0x50] sm:$0xf0]  ;;  %1542 = vmatpush.bf16.msrb.mxu1 %v3613_v59  ;;  %v3137_v21 = vld [vmem:[#allocation2 + $0x48] sm:$0xf] }
 0x10a   : > { %v701_v37 = vor.u32 %v699_v25, %v698_v30  ;;  %v879_v38 = vor.u32 %v878_v31, %v696_v24  ;;  %860 = vst [vmem:[#allocation2 + $0x7c] sm:$0xf] %v546_v32  ;;  %v2934_v39 = vor.u32 %v3580_v35, %v2933_v34  ;;  %v647_v1 = vunpack.c.l.b16 %v546_v32  ;;  %v3535_v22 = vld [vmem:[#allocation2 + $0x50] sm:$0xf0] }
 0x10b   : > { %v504_v41 = vpop.f32.mrf.mxu0 }
 0x10c   : > { %v754_v45 = vsel %vm4266_vm6, 0, %v701_v37  ;;  %v907_v47 = vsel %vm4271_vm7, %v879_v38, 0  ;;  %v505_v48 = vadd.f32 %v4250_v46, %v504_v41  ;;  %1455 = vmatmul.bf16.vlgmr.msra.gmra.mxu2 %v2934_v39  ;;  %v2947_v50 = vld [vmem:[#allocation2 + $0x6c] sm:$0xf0]  ;;  %v3138_v37 = vor.u32 %v3535_v22, %v3137_v21 }
 0x10d   : > { %v778_v51 = vunpack.c.l.b16 %v754_v45  ;;  %v779_v52 = vunpack.c.h.b16 %v754_v45  ;;  %v931_v53 = vunpack.c.l.b16 %v907_v47  ;;  %v932_v54 = vunpack.c.h.b16 %v907_v47  ;;  %v3572_v47 = vld [vmem:[#allocation8 + $0xb8] sm:$0xff]  ;;  %v3569_v21 = vld [vmem:[#allocation8 + $0xa0] sm:$0xff] }
 0x10e   : > { %v531_v56 = vmax.f32 %v505_v48, 0.0  ;;  %1494 = vmatmul.bf16.vlgmr.msra.gmra.mxu1 %v2914_v49  ;;  %v2950_v57 = vor.u32 %v3582_v55, %v2947_v50  ;;  %v3561_v50 = vld [vmem:[#allocation8 + $0x60] sm:$0xff]  ;;  %1954 = vmatpush.bf16.msrb.mxu3 %v3572_v47  ;;  %v3578_v47 = vld [vmem:[#allocation2 + $0x40] sm:$0xf0] }
 0x10f   : > { %v798_v60 = vpack.c.b16 %v778_v51, %v778_v51  ;;  %v799_v61 = vpack.c.b16 %v779_v52, %v779_v52  ;;  %v951_v62 = vpack.c.b16 %v931_v53, %v931_v53  ;;  %v952_v63 = vpack.c.b16 %v932_v54, %v932_v54  ;;  %1908 = vmatpush.bf16.msrb.mxu2 %v3561_v50  ;;  %v3571_v54 = vld [vmem:[#allocation8 + $0xb0] sm:$0xff] }
 0x110   : > { %v547_v0 = vpack.c.bf16 %v531_v56, %v531_v56  ;;  %1509 = vmatmul.bf16.gmra.mxu3 %v2950_v57 }
 0x111   : > { %838 = vst [vmem:[#allocation2 + $0x60] sm:$0xf] %v798_v60  ;;  %v3585_v34 = vld [vmem:[#allocation2 + $0x7c] sm:$0xf]  ;;  %v2917_v60 = vld [vmem:[#allocation2 + $0x20] sm:$0xf] }
 0x112   : > { %1874 = vmatmul.bf16.gmra.mxu0 %v3126_v58  ;;  %839 = vst [vmem:[#allocation2 + $0x6c] sm:$0xf] %v799_v61  ;;  %v648_v2 = vunpack.c.l.b16 %v547_v0  ;;  %v3575_v61 = vld [vmem:[#allocation2 + $0x28] sm:$0xf0]  ;;  %1955 = vmatpush.bf16.msrb.mxu3 %v3571_v54 }
 0x113   : > { %991 = vst [vmem:[#allocation2 + $0x68] sm:$0xf] %v951_v62  ;;  %v507_v3 = vpop.f32.mrf.mxu0 }
 0x114   : > { %992 = vst [vmem:[#allocation2 + $0x74] sm:$0xf] %v952_v63  ;;  %v662_v4 = vpack.c.b16 %v648_v2, %v647_v1  ;;  %v508_v5 = vadd.f32 %v4250_v46, %v507_v3 }
 0x115   : > { %861 = vst [vmem:[#allocation2 + $0x88] sm:$0xf] %v547_v0 }
 0x116   : > { %v703_v7 = vshrl.u32 %v662_v4, 16  ;;  %v706_v8 = vshll.u32 %v662_v4, 16  ;;  %v532_v9 = vmax.f32 %v508_v5, 0.0  ;;  %v3570_v4 = vld [vmem:[#allocation8 + $0xa8] sm:$0xff] }
 0x117   : > { %1956 = vmatpush.bf16.msrb.mxu3 %v3570_v4 }
 0x118   : > { %v705_v10 = vrot.slane %v703_v7, 7  ;;  %v880_v11 = vrot.slane %v706_v8, 1  ;;  %v548_v12 = vpack.c.bf16 %v532_v9, %v532_v9  ;;  %v2945_v13 = vld [vmem:[#allocation2 + $0x60] sm:$0xf] }
 0x119   : > { %v3583_v14 = vld [vmem:[#allocation2 + $0x68] sm:$0xf0]  ;;  %v3149_v2 = vld [vmem:[#allocation2 + $0x60] sm:$0xf] }
 0x11a   : > { %v708_v16 = vor.u32 %v706_v8, %v705_v10  ;;  %v881_v17 = vor.u32 %v880_v11, %v703_v7  ;;  %862 = vst [vmem:[#allocation2 + $0x94] sm:$0xf] %v548_v12  ;;  %v2946_v18 = vor.u32 %v3583_v14, %v2945_v13  ;;  %v649_v43 = vunpack.c.l.b16 %v548_v12  ;;  %v3538_v3 = vld [vmem:[#allocation2 + $0x68] sm:$0xf0] }
 0x11b   : > { %v509_v19 = vpop.f32.mrf.mxu0  ;;  %v2918_v8 = vor.u32 %v3575_v61, %v2917_v60  ;;  %1957 = vmatpush.bf16.msrb.mxu3 %v3569_v21  ;;  %v3656_v21 = vld [vmem:[#allocation8 + $0x1d8] sm:$0xff] }
 0x11c   : > { %v755_v23 = vsel %vm4266_vm6, 0, %v708_v16  ;;  %v908_v24 = vsel %vm4271_vm7, %v881_v17, 0  ;;  %v510_v25 = vadd.f32 %v4250_v46, %v509_v19  ;;  %1460 = vmatmul.bf16.gmra.mxu2 %v2946_v18  ;;  %v2959_v27 = vld [vmem:[#allocation2 + $0x84] sm:$0xf0]  ;;  %v3150_v17 = vor.u32 %v3538_v3, %v3149_v2  ;;  %v3565_v3 = vld [vmem:[#allocation8 + $0x80] sm:$0xff] }
 0x11d   : > { %v780_v28 = vunpack.c.l.b16 %v755_v23  ;;  %v781_v30 = vunpack.c.h.b16 %v755_v23  ;;  %v933_v31 = vunpack.c.l.b16 %v908_v24  ;;  %v934_v32 = vunpack.c.h.b16 %v908_v24 }
 0x11e   : > { %v533_v35 = vmax.f32 %v510_v25, 0.0  ;;  %1499 = vmatmul.bf16.gmra.mxu1 %v2926_v26  ;;  %v2962_v36 = vor.u32 %v3585_v34, %v2959_v27  ;;  %v3568_v27 = vld [vmem:[#allocation8 + $0x98] sm:$0xff]  ;;  %v3567_v34 = vld [vmem:[#allocation8 + $0x90] sm:$0xff] }
 0x11f   : > { %v800_v38 = vpack.c.b16 %v780_v28, %v780_v28  ;;  %v801_v39 = vpack.c.b16 %v781_v30, %v781_v30  ;;  %v953_v40 = vpack.c.b16 %v933_v31, %v933_v31  ;;  %v954_v41 = vpack.c.b16 %v934_v32, %v934_v32  ;;  %v3560_v31 = vld [vmem:[#allocation8 + $0x58] sm:$0xff]  ;;  %1958 = vmatpush.bf16.msrb.mxu3 %v3568_v27 }
 0x120   : > { %v549_v42 = vpack.c.bf16 %v533_v35, %v533_v35  ;;  %1514 = vmatmul.bf16.gmra.mxu3 %v2962_v36  ;;  %v3660_v32 = vld [vmem:[#allocation8 + $0x1f8] sm:$0xff]  ;;  %1909 = vmatpush.bf16.msrb.mxu2 %v3560_v31 }
 0x121   : > { %840 = vst [vmem:[#allocation2 + $0x78] sm:$0xf] %v800_v38  ;;  %v3588_v14 = vld [vmem:[#allocation2 + $0x94] sm:$0xf]  ;;  %v3559_v38 = vld [vmem:[#allocation8 + $0x50] sm:$0xff]  ;;  %2406 = vmatpush.bf16.msra.mxu0 %v3660_v32 }
 0x122   : > { %1879 = vmatmul.bf16.gmra.mxu0 %v3138_v37  ;;  %841 = vst [vmem:[#allocation2 + $0x84] sm:$0xf] %v801_v39  ;;  %v650_v44 = vunpack.c.l.b16 %v549_v42  ;;  %v3659_v39 = vld [vmem:[#allocation8 + $0x1f0] sm:$0xff] }
 0x123   : > { %993 = vst [vmem:[#allocation2 + $0x80] sm:$0xf] %v953_v40  ;;  %v512_v45 = vpop.f32.mrf.mxu0  ;;  %1959 = vmatpush.bf16.msrb.mxu3 %v3567_v34 }
 0x124   : > { %994 = vst [vmem:[#allocation2 + $0x8c] sm:$0xf] %v954_v41  ;;  %v663_v48 = vpack.c.b16 %v650_v44, %v649_v43  ;;  %v513_v49 = vadd.f32 %v4250_v46, %v512_v45  ;;  %v2929_v44 = vld [vmem:[#allocation2 + $0x38] sm:$0xf]  ;;  %1910 = vmatpush.bf16.msrb.mxu2 %v3559_v38 }
 0x125   : > { %863 = vst [vmem:[#allocation2 + $0xa0] sm:$0xf] %v549_v42  ;;  %2407 = vmatpush.bf16.msra.mxu0 %v3659_v39  ;;  %v2930_v60 = vor.u32 %v3578_v47, %v2929_v44  ;;  %v3654_v44 = vld [vmem:[#allocation8 + $0x1c8] sm:$0xff] }
 0x126   : > { %v710_v51 = vshrl.u32 %v663_v48, 16  ;;  %v713_v52 = vshll.u32 %v663_v48, 16  ;;  %v534_v53 = vmax.f32 %v513_v49, 0.0  ;;  %v3566_v48 = vld [vmem:[#allocation8 + $0x88] sm:$0xff] }
 0x127   : > { %1960 = vmatpush.bf16.msrb.mxu3 %v3566_v48 }
 0x128   : > { %v712_v55 = vrot.slane %v710_v51, 7  ;;  %v882_v56 = vrot.slane %v713_v52, 1  ;;  %v550_v57 = vpack.c.bf16 %v534_v53, %v534_v53  ;;  %v2957_v58 = vld [vmem:[#allocation2 + $0x78] sm:$0xf] }
 0x129   : > { %v3586_v59 = vld [vmem:[#allocation2 + $0x80] sm:$0xf0]  ;;  %v3161_v54 = vld [vmem:[#allocation2 + $0x78] sm:$0xf] }
 0x12a   : > { %v715_v62 = vor.u32 %v713_v52, %v712_v55  ;;  %v883_v63 = vor.u32 %v882_v56, %v710_v51  ;;  %864 = vst [vmem:[#allocation2 + $0xac] sm:$0xf] %v550_v57  ;;  %v2958_v0 = vor.u32 %v3586_v59, %v2957_v58  ;;  %v651_v24 = vunpack.c.l.b16 %v550_v57  ;;  %v3558_v52 = vld [vmem:[#allocation8 + $0x48] sm:$0xff]  ;;  %v3541_v55 = vld [vmem:[#allocation2 + $0x80] sm:$0xf0] }
 0x12b   : > { %v514_v1 = vpop.f32.mrf.mxu0  ;;  %v3658_v56 = vld [vmem:[#allocation8 + $0x1e8] sm:$0xff]  ;;  %1911 = vmatpush.bf16.msrb.mxu2 %v3558_v52  ;;  %1961 = vmatpush.bf16.msrb.mxu3 %v3565_v3 }
 0x12c   : > { %v756_v5 = vsel %vm4266_vm6, 0, %v715_v62  ;;  %v909_v6 = vsel %vm4271_vm7, %v883_v63, 0  ;;  %v515_v7 = vadd.f32 %v4250_v46, %v514_v1  ;;  %1465 = vmatmul.bf16.gmra.mxu2 %v2958_v0  ;;  %v2971_v9 = vld [vmem:[#allocation2 + $0x9c] sm:$0xf0]  ;;  %2408 = vmatpush.bf16.msra.mxu0 %v3658_v56 }
 0x12d   : > { %v782_v10 = vunpack.c.l.b16 %v756_v5  ;;  %v783_v11 = vunpack.c.h.b16 %v756_v5  ;;  %v935_v12 = vunpack.c.l.b16 %v909_v6  ;;  %v936_v13 = vunpack.c.h.b16 %v909_v6 }
 0x12e   : > { %v535_v15 = vmax.f32 %v515_v7, 0.0  ;;  %1543 = vmatmul.bf16.vlgmr.msrb.gmra.mxu1 %v2918_v8  ;;  %v2974_v16 = vor.u32 %v3588_v14, %v2971_v9  ;;  %v3162_v6 = vor.u32 %v3541_v55, %v3161_v54  ;;  %v611_v7 = vstv %s4321_s14  ;;  %s4701_s14 = sld [smem:[#allocation24_spill]] }
 0x12f   : > { %v802_v18 = vpack.c.b16 %v782_v10, %v782_v10  ;;  %v803_v19 = vpack.c.b16 %v783_v11, %v783_v11  ;;  %v955_v20 = vpack.c.b16 %v935_v12, %v935_v12  ;;  %v956_v22 = vpack.c.b16 %v936_v13, %v936_v13  ;;  %v592_v11 = vpop.f32.mrf.mxu1  ;;  %v3657_v12 = vld [vmem:[#allocation8 + $0x1e0] sm:$0xff] }
 0x130   : > { %v551_v23 = vpack.c.bf16 %v535_v15, %v535_v15  ;;  %1519 = vmatmul.bf16.gmra.mxu3 %v2974_v16  ;;  %v593_v15 = vadd.f32 %v4250_v46, %v592_v11  ;;  %v3557_v16 = vld [vmem:[#allocation8 + $0x40] sm:$0xff]  ;;  %vm4330_vm8 = vcmp.eq.s32.totalorder %v611_v7, 1  ;;  %2409 = vmatpush.bf16.msra.mxu0 %v3657_v12  ;;  %v3109_v12 = vld [vmem:[#allocation2 + $0x8] sm:$0xf] }
 0x131   : > { %842 = vst [vmem:[#allocation2 + $0x90] sm:$0xf] %v802_v18  ;;  %v3591_v2 = vld [vmem:[#allocation2 + $0xac] sm:$0xf]  ;;  %1912 = vmatpush.bf16.msrb.mxu2 %v3557_v16 }
 0x132   : > { %1884 = vmatmul.bf16.gmra.mxu0 %v3150_v17  ;;  %843 = vst [vmem:[#allocation2 + $0x9c] sm:$0xf] %v803_v19  ;;  %v652_v25 = vunpack.c.l.b16 %v551_v23 }
 0x133   : > { %995 = vst [vmem:[#allocation2 + $0x98] sm:$0xf] %v955_v20  ;;  %v517_v26 = vpop.f32.mrf.mxu0  ;;  %v599_v20 = vmax.f32 %v593_v15, 0.0 }
 0x134   : > { %996 = vst [vmem:[#allocation2 + $0xa4] sm:$0xf] %v956_v22  ;;  %v664_v28 = vpack.c.b16 %v652_v25, %v651_v24  ;;  %v518_v30 = vadd.f32 %v4250_v46, %v517_v26  ;;  %2410 = vmatpush.bf16.msra.mxu0 %v3656_v21 }
 0x135   : > { %865 = vst [vmem:[#allocation2 + $0xb8] sm:$0xf] %v551_v23  ;;  %v613_v23 = vsel %vm4330_vm8, %v599_v20, 0.0 }
 0x136   : > { %v717_v35 = vshrl.u32 %v664_v28, 16  ;;  %v720_v36 = vshll.u32 %v664_v28, 16  ;;  %v536_v37 = vmax.f32 %v518_v30, 0.0  ;;  %v615_v24 = vpack.c.bf16 %v613_v23, %v613_v23  ;;  %v3655_v28 = vld [vmem:[#allocation8 + $0x1d0] sm:$0xff] }
 0x137   : > { %v594_v27 = vpop.f32.mrf.mxu1 }
 0x138   : > { %v719_v40 = vrot.slane %v717_v35, 7  ;;  %v884_v41 = vrot.slane %v720_v36, 1  ;;  %v4316_v42 = vpack.c.bf16 %v536_v37, %v536_v37  ;;  %v2969_v43 = vld [vmem:[#allocation2 + $0x90] sm:$0xf]  ;;  %868 = vst [vmem:[#allocation2 + $0xdc] sm:$0xf] %v615_v24  ;;  %v595_v34 = vadd.f32 %v4250_v46, %v594_v27  ;;  %2411 = vmatpush.bf16.msra.mxu0 %v3655_v28 }
 0x139   : > { %v3589_v45 = vld [vmem:[#allocation2 + $0x98] sm:$0xf0]  ;;  %v3667_v28 = vld [vmem:[#allocation8 + $0x230] sm:$0xff] }
 0x13a   : > { %v722_v49 = vor.u32 %v720_v36, %v719_v40  ;;  %v885_v50 = vor.u32 %v884_v41, %v717_v35  ;;  %866 = vst [vmem:[#allocation2 + $0xc4] sm:$0xf] %v4316_v42  ;;  %v2970_v51 = vor.u32 %v3589_v45, %v2969_v43  ;;  %v653_v18 = vunpack.c.l.b16 %v4316_v42  ;;  %v2941_v36 = vld [vmem:[#allocation2 + $0x50] sm:$0xf]  ;;  %v3581_v37 = vld [vmem:[#allocation2 + $0x58] sm:$0xf0] }
 0x13b   : > { %v519_v53 = vpop.f32.mrf.mxu0  ;;  %v3173_v41 = vld [vmem:[#allocation2 + $0x90] sm:$0xf]  ;;  %v3544_v42 = vld [vmem:[#allocation2 + $0x98] sm:$0xf0]  ;;  %v600_v43 = vmax.f32 %v595_v34, 0.0  ;;  %v2942_v48 = vor.u32 %v3581_v37, %v2941_v36 }
 0x13c   : > { %v757_v57 = vsel %vm4266_vm6, 0, %v722_v49  ;;  %v910_v58 = vsel %vm4271_vm7, %v885_v50, 0  ;;  %v520_v59 = vadd.f32 %v4250_v46, %v519_v53  ;;  %1470 = vmatmul.bf16.gmra.mxu2 %v2970_v51  ;;  %v2983_v61 = vld [vmem:[#allocation2 + $0xb4] sm:$0xf0]  ;;  %v3174_v55 = vor.u32 %v3544_v42, %v3173_v41  ;;  %2412 = vmatpush.bf16.msra.mxu0 %v3654_v44  ;;  %v2965_v37 = vld [vmem:[#allocation2 + $0x80] sm:$0xf] }
 0x13d   : > { %v784_v62 = vunpack.c.l.b16 %v757_v57  ;;  %v785_v63 = vunpack.c.h.b16 %v757_v57  ;;  %v937_v0 = vunpack.c.l.b16 %v910_v58  ;;  %v938_v1 = vunpack.c.h.b16 %v910_v58  ;;  %v3668_v57 = vld [vmem:[#allocation8 + $0x238] sm:$0xff]  ;;  %v3295_v42 = vld [vmem:[#allocation2 + $0x3c] sm:$0xf0]  ;;  %v3621_v44 = vld [vmem:[#allocation2 + $0x34] sm:$0xf] }
 0x13e   : > { %v537_v4 = vmax.f32 %v520_v59, 0.0  ;;  %1548 = vmatmul.bf16.gmra.mxu1 %v2930_v60  ;;  %v2986_v5 = vor.u32 %v3591_v2, %v2983_v61  ;;  %v614_v56 = vsel %vm4330_vm8, %v600_v43, 0.0  ;;  %v3653_v61 = vld [vmem:[#allocation8 + $0x1c0] sm:$0xff]  ;;  %2455 = vmatpush.bf16.msra.mxu2 %v3668_v57  ;;  %v3530_v41 = vld [vmem:[#allocation2 + $0x28] sm:$0xf0] }
 0x13f   : > { %v804_v8 = vpack.c.b16 %v784_v62, %v784_v62  ;;  %v805_v9 = vpack.c.b16 %v785_v63, %v785_v63  ;;  %v957_v10 = vpack.c.b16 %v937_v0, %v937_v0  ;;  %v958_v13 = vpack.c.b16 %v938_v1, %v938_v1  ;;  %v3652_v1 = vld [vmem:[#allocation8 + $0x1b8] sm:$0xff]  ;;  %v3533_v57 = vld [vmem:[#allocation2 + $0x40] sm:$0xf0] }
 0x140   : > { %v553_v14 = vpack.c.bf16 %v537_v4, %v537_v4  ;;  %1524 = vmatmul.bf16.gmra.mxu3 %v2986_v5  ;;  %v655_v63 = vunpack.c.l.b16 %v615_v24  ;;  %v616_v0 = vpack.c.bf16 %v614_v56, %v614_v56  ;;  %2357 = vmatpush.bf16.msra.mxu1 %v3652_v1  ;;  %v3133_v56 = vld [vmem:[#allocation2 + $0x38] sm:$0xf] }
 0x141   : > { %844 = vst [vmem:[#allocation2 + $0xa8] sm:$0xf] %v804_v8  ;;  %v3594_v53 = vld [vmem:[#allocation2 + $0xc4] sm:$0xf]  ;;  %2413 = vmatpush.bf16.msra.mxu0 %v3653_v61  ;;  %v3584_v8 = vld [vmem:[#allocation2 + $0x70] sm:$0xf0] }
 0x142   : > { %1889 = vmatmul.bf16.gmra.mxu0 %v3162_v6  ;;  %845 = vst [vmem:[#allocation2 + $0xb4] sm:$0xf] %v805_v9  ;;  %v654_v19 = vunpack.c.l.b16 %v553_v14  ;;  %v656_v2 = vunpack.c.l.b16 %v616_v0  ;;  %v2953_v6 = vld [vmem:[#allocation2 + $0x68] sm:$0xf]  ;;  %2456 = vmatpush.bf16.msra.mxu2 %v3667_v28  ;;  %v3624_v61 = vld [vmem:[#allocation2 + $0x4c] sm:$0xf] }
 0x143   : > { %997 = vst [vmem:[#allocation2 + $0xb0] sm:$0xf] %v957_v10 }
 0x144   : > { %998 = vst [vmem:[#allocation2 + $0xbc] sm:$0xf] %v958_v13  ;;  %v665_v22 = vpack.c.b16 %v654_v19, %v653_v18  ;;  %v666_v3 = vpack.c.b16 %v656_v2, %v655_v63  ;;  %v3527_v13 = vld [vmem:[#allocation2 + $0x10] sm:$0xf0]  ;;  %v2954_v19 = vor.u32 %v3584_v8, %v2953_v6  ;;  %v3648_v2 = vld [vmem:[#allocation8 + $0x198] sm:$0xff]  ;;  %v3646_v6 = vld [vmem:[#allocation8 + $0x188] sm:$0xff] }
 0x145   : > { %867 = vst [vmem:[#allocation2 + $0xd0] sm:$0xf] %v553_v14  ;;  %v3110_v20 = vor.u32 %v3527_v13, %v3109_v12  ;;  %v3145_v13 = vld [vmem:[#allocation2 + $0x50] sm:$0xf] }
 0x146   : > { %v724_v25 = vshrl.u32 %v665_v22, 16  ;;  %v727_v26 = vshll.u32 %v665_v22, 16  ;;  %869 = vst [vmem:[#allocation2 + $0xe8] sm:$0xf] %v616_v0  ;;  %v731_v4 = vshrl.u32 %v666_v3, 16  ;;  %v734_v5 = vshll.u32 %v666_v3, 16 }
 0x147   : > { %v3665_v0 = vld [vmem:[#allocation8 + $0x220] sm:$0xff] }
 0x148   : > { %v726_v30 = vrot.slane %v724_v25, 7  ;;  %v886_v31 = vrot.slane %v727_v26, 1  ;;  %v2981_v32 = vld [vmem:[#allocation2 + $0xa8] sm:$0xf]  ;;  %v733_v9 = vrot.slane %v731_v4, 7  ;;  %v888_v10 = vrot.slane %v734_v5, 1 }
 0x149   : > { %v3592_v35 = vld [vmem:[#allocation2 + $0xb0] sm:$0xf0]  ;;  %v3185_v17 = vld [vmem:[#allocation2 + $0xa8] sm:$0xf] }
 0x14a   : > { %v729_v38 = vor.u32 %v727_v26, %v726_v30  ;;  %v887_v39 = vor.u32 %v886_v31, %v724_v25  ;;  %v2982_v40 = vor.u32 %v3592_v35, %v2981_v32  ;;  %v736_v15 = vor.u32 %v734_v5, %v733_v9  ;;  %v3547_v18 = vld [vmem:[#allocation2 + $0xb0] sm:$0xf0]  ;;  %v3651_v35 = vld [vmem:[#allocation8 + $0x1b0] sm:$0xff]  ;;  %v2989_v8 = vld [vmem:[#allocation2 + $0xb0] sm:$0xf] }
 0x14b   : > { %v889_v16 = vor.u32 %v888_v10, %v731_v4  ;;  %v3186_v27 = vor.u32 %v3547_v18, %v3185_v17  ;;  %2358 = vmatpush.bf16.msra.mxu1 %v3651_v35  ;;  %v3647_v4 = vld [vmem:[#allocation8 + $0x190] sm:$0xff]  ;;  %v3593_v9 = vld [vmem:[#allocation2 + $0xb8] sm:$0xf0]  ;;  %v3531_v10 = vld [vmem:[#allocation2 + $0x34] sm:$0xf] }
 0x14c   : > { %v758_v45 = vsel %vm4266_vm6, 0, %v729_v38  ;;  %v911_v47 = vsel %vm4271_vm7, %v887_v39, 0  ;;  %1475 = vmatmul.bf16.gmra.mxu2 %v2982_v40  ;;  %v2995_v46 = vld [vmem:[#allocation2 + $0xcc] sm:$0xf0]  ;;  %v759_v21 = vsel %vm4266_vm6, 0, %v736_v15  ;;  %v3106_v39 = vor.u32 %v3525_v29, %v3103_v33 }
 0x14d   : > { %v786_v49 = vunpack.c.l.b16 %v758_v45  ;;  %v787_v50 = vunpack.c.h.b16 %v758_v45  ;;  %v939_v51 = vunpack.c.l.b16 %v911_v47  ;;  %v940_v52 = vunpack.c.h.b16 %v911_v47  ;;  %v3587_v38 = vld [vmem:[#allocation2 + $0x88] sm:$0xf0]  ;;  %v3121_v40 = vld [vmem:[#allocation2 + $0x20] sm:$0xf]  ;;  %v3319_v15 = vld [vmem:[#allocation2 + $0x6c] sm:$0xf0] }
 0x14e   : > { %1553 = vmatmul.bf16.gmra.mxu1 %v2942_v48  ;;  %v2998_v54 = vor.u32 %v3594_v53, %v2995_v46  ;;  %v912_v22 = vsel %vm4271_vm7, %v889_v16, 0  ;;  %v788_v23 = vunpack.c.l.b16 %v759_v21  ;;  %v789_v24 = vunpack.c.h.b16 %v759_v21  ;;  %v3666_v48 = vld [vmem:[#allocation8 + $0x228] sm:$0xff]  ;;  %v3127_v5 = vld [vmem:[#allocation2 + $0x3c] sm:$0xf0]  ;;  %v3645_v18 = vld [vmem:[#allocation8 + $0x180] sm:$0xff] }
 0x14f   : > { %v806_v58 = vpack.c.b16 %v786_v49, %v786_v49  ;;  %v807_v59 = vpack.c.b16 %v787_v50, %v787_v50  ;;  %v959_v60 = vpack.c.b16 %v939_v51, %v939_v51  ;;  %v960_v62 = vpack.c.b16 %v940_v52, %v940_v52  ;;  %2457 = vmatpush.bf16.msra.mxu2 %v3666_v48  ;;  %v3650_v49 = vld [vmem:[#allocation8 + $0x1a8] sm:$0xff]  ;;  %v3115_v50 = vld [vmem:[#allocation2 + $0x24] sm:$0xf0]  ;;  %v3590_v52 = vld [vmem:[#allocation2 + $0xa0] sm:$0xf0] }
 0x150   : > { %1529 = vmatmul.bf16.gmra.mxu3 %v2998_v54  ;;  %v941_v25 = vunpack.c.l.b16 %v912_v22  ;;  %v942_v26 = vunpack.c.h.b16 %v912_v22  ;;  %v808_v30 = vpack.c.b16 %v788_v23, %v788_v23  ;;  %v809_v31 = vpack.c.b16 %v789_v24, %v789_v24  ;;  %2359 = vmatpush.bf16.msra.mxu1 %v3650_v49  ;;  %v2977_v51 = vld [vmem:[#allocation2 + $0x98] sm:$0xf]  ;;  %v3528_v53 = vld [vmem:[#allocation2 + $0x1c] sm:$0xf]  ;;  %v3664_v23 = vld [vmem:[#allocation8 + $0x218] sm:$0xff] }
 0x151   : > { %846 = vst [vmem:[#allocation2 + $0xc0] sm:$0xf] %v806_v58  ;;  %v2966_v43 = vor.u32 %v3587_v38, %v2965_v37  ;;  %v3122_v45 = vor.u32 %v3530_v41, %v3121_v40  ;;  %v3298_v47 = vor.u32 %v3621_v44, %v3295_v42  ;;  %v3118_v54 = vor.u32 %v3528_v53, %v3115_v50  ;;  %v3307_v58 = vld [vmem:[#allocation2 + $0x54] sm:$0xf0]  ;;  %v3534_v33 = vld [vmem:[#allocation2 + $0x4c] sm:$0xf] }
 0x152   : > { %1894 = vmatmul.bf16.gmra.mxu0 %v3174_v55  ;;  %847 = vst [vmem:[#allocation2 + $0xcc] sm:$0xf] %v807_v59  ;;  %v961_v32 = vpack.c.b16 %v941_v25, %v941_v25  ;;  %v962_v34 = vpack.c.b16 %v942_v26, %v942_v26  ;;  %v2978_v59 = vor.u32 %v3590_v52, %v2977_v51  ;;  %v3539_v40 = vld [vmem:[#allocation2 + $0x70] sm:$0xf0]  ;;  %v3331_v41 = vld [vmem:[#allocation2 + $0x84] sm:$0xf0] }
 0x153   : > { %999 = vst [vmem:[#allocation2 + $0xc8] sm:$0xf] %v959_v60  ;;  %v3649_v60 = vld [vmem:[#allocation8 + $0x1a0] sm:$0xff]  ;;  %v3310_v63 = vor.u32 %v3624_v61, %v3307_v58  ;;  %2458 = vmatpush.bf16.msra.mxu2 %v3665_v0  ;;  %v2990_v17 = vor.u32 %v3593_v9, %v2989_v8  ;;  %v3630_v44 = vld [vmem:[#allocation2 + $0x7c] sm:$0xf]  ;;  %v3663_v48 = vld [vmem:[#allocation8 + $0x210] sm:$0xff] }
 0x154   : > { %1000 = vst [vmem:[#allocation2 + $0xd4] sm:$0xf] %v960_v62  ;;  %v3134_v62 = vor.u32 %v3533_v57, %v3133_v56  ;;  %2360 = vmatpush.bf16.msra.mxu1 %v3649_v60  ;;  %v3537_v57 = vld [vmem:[#allocation2 + $0x64] sm:$0xf]  ;;  %v3293_v58 = vld [vmem:[#allocation2 + $0x30] sm:$0xf] }
 0x155   : > { %848 = vst [vmem:[#allocation2 + $0xd8] sm:$0xf] %v808_v30  ;;  %v3343_v0 = vld [vmem:[#allocation2 + $0x9c] sm:$0xf0]  ;;  %v3662_v8 = vld [vmem:[#allocation8 + $0x208] sm:$0xff] }
 0x156   : > { %849 = vst [vmem:[#allocation2 + $0xe4] sm:$0xf] %v809_v31  ;;  %v3139_v31 = vld [vmem:[#allocation2 + $0x54] sm:$0xf0] }
 0x157   : > { %1001 = vst [vmem:[#allocation2 + $0xe0] sm:$0xf] %v961_v32  ;;  %2459 = vmatpush.bf16.msra.mxu2 %v3664_v23 }
 0x158   : > { %v2993_v7 = vld [vmem:[#allocation2 + $0xc0] sm:$0xf]  ;;  %1002 = vst [vmem:[#allocation2 + $0xec] sm:$0xf] %v962_v34  ;;  %2361 = vmatpush.bf16.msra.mxu1 %v3648_v2 }
 0x159   : > { %v3595_v11 = vld [vmem:[#allocation2 + $0xc8] sm:$0xf0] }
 0x15a   : > { %v2994_v14 = vor.u32 %v3595_v11, %v2993_v7  ;;  %v3130_v11 = vor.u32 %v3531_v10, %v3127_v5  ;;  %v3001_v35 = vld [vmem:[#allocation2 + $0xc8] sm:$0xf] }
 0x15b   : > { %v3596_v29 = vld [vmem:[#allocation2 + $0xd0] sm:$0xf0]  ;;  %2460 = vmatpush.bf16.msra.mxu2 %v3663_v48  ;;  %v3628_v48 = vld [vmem:[#allocation2 + $0x68] sm:$0xf0] }
 0x15c   : > { %1480 = vmatmul.bf16.gmra.mxu2 %v2994_v14  ;;  %2362 = vmatpush.bf16.msra.mxu1 %v3647_v4  ;;  %v3536_v14 = vld [vmem:[#allocation2 + $0x58] sm:$0xf0] }
 0x15d   : > { %v3146_v21 = vor.u32 %v3536_v14, %v3145_v13 }
 0x15e   : > { %1558 = vmatmul.bf16.gmra.mxu1 %v2954_v19  ;;  %v3627_v19 = vld [vmem:[#allocation2 + $0x64] sm:$0xf] }
 0x15f   : > { %v3322_v22 = vor.u32 %v3627_v19, %v3319_v15  ;;  %2461 = vmatpush.bf16.msra.mxu2 %v3662_v8  ;;  %v3540_v19 = vld [vmem:[#allocation2 + $0x7c] sm:$0xf]  ;;  %v3546_v8 = vld [vmem:[#allocation2 + $0xac] sm:$0xf] }
 0x160   : > { %1962 = vmatmul.bf16.vlgmr.msrb.gmra.mxu3 %v3110_v20  ;;  %2363 = vmatpush.bf16.msra.mxu1 %v3646_v6  ;;  %v3633_v6 = vld [vmem:[#allocation2 + $0x94] sm:$0xf] }
 0x162   : > { %1899 = vmatmul.bf16.gmra.mxu0 %v3186_v27 }
 0x164   : > { %2364 = vmatpush.bf16.msra.mxu1 %v3645_v18  ;;  %v3163_v18 = vld [vmem:[#allocation2 + $0x84] sm:$0xf0] }
 0x169   : > { %v1446_v36 = vpop.f32.mrf.mxu1 }
 0x16c   : > { %1913 = vmatmul.bf16.vlgmr.msrb.gmra.mxu2 %v3106_v39  ;;  %v3157_v39 = vld [vmem:[#allocation2 + $0x68] sm:$0xf] }
 0x16e   : > { %1563 = vmatmul.bf16.gmra.mxu1 %v2966_v43  ;;  %v3002_v43 = vor.u32 %v3596_v29, %v3001_v35  ;;  %v3636_v35 = vld [vmem:[#allocation2 + $0xac] sm:$0xf]  ;;  %v3661_v29 = vld [vmem:[#allocation8 + $0x200] sm:$0xff] }
 0x16f   : > { %v4352_v20 = vpop.f32.mrf.mxu0  ;;  %2462 = vmatpush.bf16.msra.mxu2 %v3661_v29 }
 0x170   : > { %1967 = vmatmul.bf16.gmra.mxu3 %v3122_v45  ;;  %v3158_v45 = vor.u32 %v3539_v40, %v3157_v39 }
 0x171   : > { %v1448_v46 = vpop.f32.mrf.mxu1 }
 0x172   : > { %2414 = vmatmul.bf16.vlgmr.msra.gmra.mxu0 %v3298_v47  ;;  %v3334_v47 = vor.u32 %v3630_v44, %v3331_v41  ;;  %v3175_v44 = vld [vmem:[#allocation2 + $0x9c] sm:$0xf0] }
 0x177   : > { %v1867_v32 = vpop.f32.mrf.mxu0 }
 0x17b   : > { %v4348_v55 = vpop.f32.mrf.mxu1 }
 0x17c   : > { %1918 = vmatmul.bf16.gmra.mxu2 %v3118_v54 }
 0x17e   : > { %1568 = vmatmul.bf16.gmra.mxu1 %v2978_v59  ;;  %v3622_v59 = vld [vmem:[#allocation2 + $0x38] sm:$0xf0] }
 0x17f   : > { %v1505_v1 = vpop.f32.mrf.mxu3  ;;  %v1870_v50 = vpop.f32.mrf.mxu0  ;;  %v3294_v4 = vor.u32 %v3622_v59, %v3293_v58 }
 0x180   : > { %1972 = vmatmul.bf16.gmra.mxu3 %v3134_v62  ;;  %v3169_v62 = vld [vmem:[#allocation2 + $0x80] sm:$0xf] }
 0x182   : > { %2419 = vmatmul.bf16.gmra.mxu0 %v3310_v63  ;;  %v3542_v63 = vld [vmem:[#allocation2 + $0x88] sm:$0xf0] }
 0x183   : > { %v4350_v3 = vpop.f32.mrf.mxu1 }
 0x187   : > { %v1507_v7 = vpop.f32.mrf.mxu3 }
 0x18b   : > { %v1495_v12 = vpop.f32.mrf.mxu1 }
 0x18c   : > { %v1496_v16 = vadd.f32 %v1495_v12, %v1446_v36  ;;  %1923 = vmatmul.bf16.gmra.mxu2 %v3130_v11  ;;  %v3142_v36 = vor.u32 %v3534_v33, %v3139_v31 }
 0x18e   : > { %1573 = vmatmul.bf16.gmra.mxu1 %v2990_v17 }
 0x18f   : > { %v1456_v24 = vpop.f32.mrf.mxu2 }
 0x190   : > { %1977 = vmatmul.bf16.gmra.mxu3 %v3146_v21  ;;  %v4354_v25 = vadd.f32 %v1505_v1, %v1456_v24  ;;  %v1872_v1 = vpop.f32.mrf.mxu0  ;;  %v3305_v21 = vld [vmem:[#allocation2 + $0x48] sm:$0xf]  ;;  %v3181_v24 = vld [vmem:[#allocation2 + $0x98] sm:$0xf] }
 0x192   : > { %2424 = vmatmul.bf16.gmra.mxu0 %v3322_v22  ;;  %v3625_v22 = vld [vmem:[#allocation2 + $0x50] sm:$0xf0] }
 0x193   : > { %v1510_v26 = vpop.f32.mrf.mxu3  ;;  %v1497_v27 = vpop.f32.mrf.mxu1  ;;  %v3306_v31 = vor.u32 %v3625_v22, %v3305_v21 }
 0x194   : > { %v1498_v28 = vadd.f32 %v1497_v27, %v1448_v46  ;;  %v3355_v27 = vld [vmem:[#allocation2 + $0xb4] sm:$0xf0] }
 0x197   : > { %v1458_v30 = vpop.f32.mrf.mxu2 }
 0x198   : > { %v4356_v34 = vadd.f32 %v1507_v7, %v1458_v30  ;;  %v3346_v7 = vor.u32 %v3633_v6, %v3343_v0  ;;  %v1875_v14 = vpop.f32.mrf.mxu0 }
 0x19b   : > { %v1512_v37 = vpop.f32.mrf.mxu3  ;;  %v1500_v38 = vpop.f32.mrf.mxu1 }
 0x19c   : > { %v1501_v42 = vadd.f32 %v1500_v38, %v4348_v55  ;;  %1928 = vmatmul.bf16.gmra.mxu2 %v3142_v36  ;;  %v3151_v55 = vld [vmem:[#allocation2 + $0x6c] sm:$0xf0] }
 0x19d   : > { %v3154_v60 = vor.u32 %v3537_v57, %v3151_v55  ;;  %v3548_v55 = vld [vmem:[#allocation2 + $0xb8] sm:$0xf0]  ;;  %v3367_v57 = vld [vmem:[#allocation2 + $0xcc] sm:$0xf0] }
 0x19e   : > { %1578 = vmatmul.bf16.gmra.mxu1 %v3002_v43 }
 0x19f   : > { %v1461_v46 = vpop.f32.mrf.mxu2 }
 0x1a0   : > { %1982 = vmatmul.bf16.gmra.mxu3 %v3158_v45  ;;  %v4359_v49 = vadd.f32 %v1510_v26, %v1461_v46  ;;  %v3545_v26 = vld [vmem:[#allocation2 + $0xa0] sm:$0xf0]  ;;  %v3543_v45 = vld [vmem:[#allocation2 + $0x94] sm:$0xf] }
 0x1a2   : > { %2429 = vmatmul.bf16.gmra.mxu0 %v3334_v47  ;;  %v3317_v47 = vld [vmem:[#allocation2 + $0x60] sm:$0xf] }
 0x1a3   : > { %v1515_v51 = vpop.f32.mrf.mxu3  ;;  %v1502_v52 = vpop.f32.mrf.mxu1  ;;  %v3318_v59 = vor.u32 %v3628_v48, %v3317_v47 }
 0x1a4   : > { %v1503_v53 = vadd.f32 %v1502_v52, %v4350_v3  ;;  %v3170_v3 = vor.u32 %v3542_v63, %v3169_v62 }
 0x1a7   : > { %v1463_v54 = vpop.f32.mrf.mxu2 }
 0x1a8   : > { %v4362_v56 = vadd.f32 %v1512_v37, %v1463_v54  ;;  %v1877_v37 = vpop.f32.mrf.mxu0  ;;  %v3193_v54 = vld [vmem:[#allocation2 + $0xb0] sm:$0xf] }
 0x1ab   : > { %v1544_v61 = vpop.f32.mrf.mxu1  ;;  %v4364_v5 = vpop.f32.mrf.mxu3 }
 0x1ac   : > { %v1545_v2 = vadd.f32 %v1544_v61, %v1496_v16  ;;  %1933 = vmatmul.bf16.gmra.mxu2 %v3154_v60  ;;  %v3194_v60 = vor.u32 %v3548_v55, %v3193_v54  ;;  %v3675_v54 = vld [vmem:[%s4700_s19 + $0x30] sm:$0xff] }
 0x1ae   : > { %2365 = vmatmul.bf16.vlgmr.msra.gmra.mxu1 %v3294_v4  ;;  %v4367_v9 = vadd.f32 %v4352_v20, %v1545_v2  ;;  %v3166_v20 = vor.u32 %v3540_v19, %v3163_v18  ;;  %v3379_v18 = vld [vmem:[#allocation2 + $0xe4] sm:$0xf0] }
 0x1af   : > { %v1466_v10 = vpop.f32.mrf.mxu2 }
 0x1b0   : > { %1987 = vmatmul.bf16.gmra.mxu3 %v3170_v3  ;;  %v4369_v11 = vadd.f32 %v1515_v51, %v1466_v10  ;;  %v1880_v46 = vpop.f32.mrf.mxu0  ;;  %v3329_v10 = vld [vmem:[#allocation2 + $0x78] sm:$0xf] }
 0x1b2   : > { %2434 = vmatmul.bf16.gmra.mxu0 %v3346_v7  ;;  %v3187_v7 = vld [vmem:[#allocation2 + $0xb4] sm:$0xf0] }
 0x1b3   : > { %v1546_v12 = vpop.f32.mrf.mxu1  ;;  %v1520_v16 = vpop.f32.mrf.mxu3 }
 0x1b4   : > { %v1547_v13 = vadd.f32 %v1546_v12, %v1498_v28  ;;  %v3182_v28 = vor.u32 %v3545_v26, %v3181_v24  ;;  %v3631_v12 = vld [vmem:[#allocation2 + $0x80] sm:$0xf0] }
 0x1b5   : > { %v3330_v21 = vor.u32 %v3631_v12, %v3329_v10  ;;  %v3674_v10 = vld [vmem:[%s4700_s19 + $0x28] sm:$0xff] }
 0x1b6   : > { %v4371_v15 = vadd.f32 %v1867_v32, %v1547_v13  ;;  %v3358_v32 = vor.u32 %v3636_v35, %v3355_v27  ;;  %v3190_v13 = vor.u32 %v3546_v8, %v3187_v7 }
 0x1b7   : > { %v4373_v17 = vpop.f32.mrf.mxu2 }
 0x1b8   : > { %v1882_v2 = vpop.f32.mrf.mxu0 }
 0x1bb   : > { %v1549_v23 = vpop.f32.mrf.mxu1  ;;  %v4379_v39 = vpop.f32.mrf.mxu3 }
 0x1bc   : > { %v1550_v30 = vadd.f32 %v1549_v23, %v1501_v42  ;;  %1938 = vmatmul.bf16.gmra.mxu2 %v3166_v20 }
 0x1be   : > { %2370 = vmatmul.bf16.gmra.mxu1 %v3306_v31  ;;  %v4375_v33 = vadd.f32 %v1870_v50, %v1550_v30  ;;  %v3178_v50 = vor.u32 %v3543_v45, %v3175_v44  ;;  %v3676_v31 = vld [vmem:[%s4700_s19 + $0x38] sm:$0xff] }
 0x1bf   : > { %v1471_v36 = vpop.f32.mrf.mxu2  ;;  %2632 = vmatpush.bf16.msra.mxu3 %v3676_v31 }
 0x1c0   : > { %1992 = vmatmul.bf16.gmra.mxu3 %v3182_v28  ;;  %v4377_v38 = vadd.f32 %v1520_v16, %v1471_v36  ;;  %v3642_v16 = vld [vmem:[#allocation2 + $0xdc] sm:$0xf]  ;;  %v1885_v22 = vpop.f32.mrf.mxu0  ;;  %v3301_v28 = vld [vmem:[#allocation2 + $0x38] sm:$0xf]  ;;  %v3341_v36 = vld [vmem:[#allocation2 + $0x90] sm:$0xf] }
 0x1c2   : > { %2439 = vmatmul.bf16.gmra.mxu0 %v3358_v32  ;;  %v3623_v32 = vld [vmem:[#allocation2 + $0x40] sm:$0xf0] }
 0x1c3   : > { %v1551_v40 = vpop.f32.mrf.mxu1  ;;  %v1525_v51 = vpop.f32.mrf.mxu3  ;;  %2633 = vmatpush.bf16.msra.mxu3 %v3675_v54 }
 0x1c4   : > { %v1552_v41 = vadd.f32 %v1551_v40, %v1503_v53  ;;  %v3639_v53 = vld [vmem:[#allocation2 + $0xc4] sm:$0xf]  ;;  %v3302_v40 = vor.u32 %v3623_v32, %v3301_v28 }
 0x1c5   : > { %v3370_v61 = vor.u32 %v3639_v53, %v3367_v57  ;;  %v3313_v57 = vld [vmem:[#allocation2 + $0x50] sm:$0xf]  ;;  %v3637_v53 = vld [vmem:[#allocation2 + $0xb0] sm:$0xf0]  ;;  %v3673_v28 = vld [vmem:[%s4700_s19 + $0x20] sm:$0xff] }
 0x1c6   : > { %v4381_v42 = vadd.f32 %v1872_v1, %v1552_v41 }
 0x1c7   : > { %v4383_v43 = vpop.f32.mrf.mxu2  ;;  %2634 = vmatpush.bf16.msra.mxu3 %v3674_v10 }
 0x1c8   : > { %v1887_v29 = vpop.f32.mrf.mxu0 }
 0x1cb   : > { %v1554_v52 = vpop.f32.mrf.mxu1  ;;  %v4391_v6 = vpop.f32.mrf.mxu3  ;;  %2635 = vmatpush.bf16.msra.mxu3 %v3673_v28 }
 0x1cc   : > { %v1555_v58 = vadd.f32 %v1554_v52, %v4354_v25  ;;  %1943 = vmatmul.bf16.gmra.mxu2 %v3178_v50 }
 0x1ce   : > { %2375 = vmatmul.bf16.gmra.mxu1 %v3318_v59  ;;  %v4386_v62 = vadd.f32 %v1875_v14, %v1555_v58  ;;  %v3626_v58 = vld [vmem:[#allocation2 + $0x58] sm:$0xf0] }
 0x1cf   : > { %v1476_v63 = vpop.f32.mrf.mxu2 }
 0x1d0   : > { %1997 = vmatmul.bf16.gmra.mxu3 %v3194_v60  ;;  %v4388_v0 = vadd.f32 %v1525_v51, %v1476_v63  ;;  %v1890_v50 = vpop.f32.mrf.mxu0  ;;  %v3314_v60 = vor.u32 %v3626_v58, %v3313_v57 }
 0x1d2   : > { %2444 = vmatmul.bf16.gmra.mxu0 %v3370_v61 }
 0x1d3   : > { %v1556_v1 = vpop.f32.mrf.mxu1  ;;  %v1530_v23 = vpop.f32.mrf.mxu3 }
 0x1d4   : > { %v1557_v4 = vadd.f32 %v1556_v1, %v4356_v34  ;;  %v3382_v34 = vor.u32 %v3642_v16, %v3379_v18  ;;  %v3629_v16 = vld [vmem:[#allocation2 + $0x70] sm:$0xf0] }
 0x1d6   : > { %v4393_v25 = vadd.f32 %v1877_v37, %v1557_v4  ;;  %v3634_v37 = vld [vmem:[#allocation2 + $0x98] sm:$0xf0] }
 0x1d7   : > { %v4395_v3 = vpop.f32.mrf.mxu2  ;;  %v3342_v45 = vor.u32 %v3634_v37, %v3341_v36  ;;  %v3632_v36 = vld [vmem:[#allocation2 + $0x88] sm:$0xf0] }
 0x1d8   : > { %v1892_v63 = vpop.f32.mrf.mxu0 }
 0x1db   : > { %v1559_v14 = vpop.f32.mrf.mxu1 }
 0x1dc   : > { %v1560_v19 = vadd.f32 %v1559_v14, %v4359_v49  ;;  %1948 = vmatmul.bf16.gmra.mxu2 %v3190_v13  ;;  %v3325_v14 = vld [vmem:[#allocation2 + $0x68] sm:$0xf] }
 0x1de   : > { %2380 = vmatmul.bf16.gmra.mxu1 %v3330_v21  ;;  %v4398_v20 = vadd.f32 %v1880_v46, %v1560_v19  ;;  %v1518_v46 = vadd.f32 %v4364_v5, %v4373_v17  ;;  %v3640_v19 = vld [vmem:[#allocation2 + $0xc8] sm:$0xf0]  ;;  %v3326_v21 = vor.u32 %v3629_v16, %v3325_v14 }
 0x1df   : > { %v1481_v24 = vpop.f32.mrf.mxu2 }
 0x1e0   : > { %v4400_v26 = vadd.f32 %v1530_v23, %v1481_v24  ;;  %v1895_v12 = vpop.f32.mrf.mxu0 }
 0x1e2   : > { %2449 = vmatmul.bf16.gmra.mxu0 %v3382_v34 }
 0x1e3   : > { %v1561_v27 = vpop.f32.mrf.mxu1 }
 0x1e4   : > { %v1562_v30 = vadd.f32 %v1561_v27, %v4362_v56 }
 0x1e6   : > { %v4406_v49 = vadd.f32 %v1882_v2, %v1562_v30 }
 0x1e7   : > { %v4408_v35 = vpop.f32.mrf.mxu2 }
 0x1e8   : > { %v1897_v27 = vpop.f32.mrf.mxu0 }
 0x1eb   : > { %v1564_v41 = vpop.f32.mrf.mxu1 }
 0x1ec   : > { %v1565_v44 = vadd.f32 %v1564_v41, %v4369_v11  ;;  %2463 = vmatmul.bf16.vlgmr.msra.gmra.mxu2 %v3302_v40  ;;  %v3643_v40 = vld [vmem:[#allocation2 + $0xe0] sm:$0xf0] }
 0x1ee   : > { %2385 = vmatmul.bf16.gmra.mxu1 %v3342_v45  ;;  %v4411_v56 = vadd.f32 %v1885_v22, %v1565_v44 }
 0x1ef   : > { %v1914_v47 = vpop.f32.mrf.mxu2 }
 0x1f0   : > { %v4414_v48 = vadd.f32 %v1914_v47, %v4367_v9  ;;  %v3353_v9 = vld [vmem:[#allocation2 + $0xa8] sm:$0xf]  ;;  %v1900_v44 = vpop.f32.mrf.mxu0 }
 0x1f1   : > { %v3354_v61 = vor.u32 %v3637_v53, %v3353_v9  ;;  %v3349_v9 = vld [vmem:[#allocation2 + $0x98] sm:$0xf]  ;;  %v3635_v53 = vld [vmem:[#allocation2 + $0xa0] sm:$0xf0] }
 0x1f3   : > { %v1566_v51 = vpop.f32.mrf.mxu1 }
 0x1f4   : > { %v1567_v52 = vadd.f32 %v1566_v51, %v1518_v46  ;;  %v1532_v51 = vpop.f32.mrf.mxu3 }
 0x1f6   : > { %v4421_v11 = vadd.f32 %v1887_v29, %v1567_v52  ;;  %v3337_v29 = vld [vmem:[#allocation2 + $0x80] sm:$0xf]  ;;  %v1533_v52 = vadd.f32 %v1532_v51, %v4408_v35 }
 0x1f7   : > { %v1916_v55 = vpop.f32.mrf.mxu2  ;;  %v3338_v41 = vor.u32 %v3632_v36, %v3337_v29 }
 0x1f8   : > { %v4424_v59 = vadd.f32 %v1916_v55, %v4371_v15  ;;  %v1523_v15 = vadd.f32 %v4379_v39, %v4383_v43  ;;  %v3672_v55 = vld [vmem:[%s4700_s19 + $0x18] sm:$0xff]  ;;  %v1902_v57 = vpop.f32.mrf.mxu0 }
 0x1f9   : > { %2636 = vmatpush.bf16.msra.mxu3 %v3672_v55 }
 0x1fb   : > { %v1569_v5 = vpop.f32.mrf.mxu1 }
 0x1fc   : > { %v1570_v17 = vadd.f32 %v1569_v5, %v4377_v38  ;;  %2468 = vmatmul.bf16.gmra.mxu2 %v3314_v60 }
 0x1fe   : > { %2390 = vmatmul.bf16.gmra.mxu1 %v3354_v61  ;;  %v4427_v1 = vadd.f32 %v1890_v50, %v1570_v17  ;;  %v3671_v17 = vld [vmem:[%s4700_s19 + $0x10] sm:$0xff] }
 0x1ff   : > { %v1919_v2 = vpop.f32.mrf.mxu2  ;;  %2637 = vmatpush.bf16.msra.mxu3 %v3671_v17 }
 0x200   : > { %v4430_v4 = vadd.f32 %v1919_v2, %v4375_v33  ;;  %v3365_v33 = vld [vmem:[#allocation2 + $0xc0] sm:$0xf]  ;;  %v3638_v2 = vld [vmem:[#allocation2 + $0xb8] sm:$0xf0] }
 0x201   : > { %v3366_v22 = vor.u32 %v3640_v19, %v3365_v33  ;;  %v2415_v33 = vpop.f32.mrf.mxu0 }
 0x203   : > { %v1571_v7 = vpop.f32.mrf.mxu1 }
 0x204   : > { %v1572_v8 = vadd.f32 %v1571_v7, %v1523_v15 }
 0x206   : > { %v4437_v38 = vadd.f32 %v1892_v63, %v1572_v8  ;;  %v3361_v63 = vld [vmem:[#allocation2 + $0xb0] sm:$0xf] }
 0x207   : > { %v1921_v13 = vpop.f32.mrf.mxu2  ;;  %v3362_v7 = vor.u32 %v3638_v2, %v3361_v63 }
 0x208   : > { %v4440_v18 = vadd.f32 %v1921_v13, %v4381_v42  ;;  %v1528_v42 = vadd.f32 %v4391_v6, %v4395_v3  ;;  %v3641_v13 = vld [vmem:[#allocation2 + $0xd0] sm:$0xf0] }
 0x20b   : > { %v1574_v39 = vpop.f32.mrf.mxu1 }
 0x20c   : > { %v1575_v43 = vadd.f32 %v1574_v39, %v4388_v0  ;;  %2473 = vmatmul.bf16.gmra.mxu2 %v3326_v21  ;;  %v3669_v39 = vld [vmem:[%s4700_s19] sm:$0xff] }
 0x20e   : > { %2395 = vmatmul.bf16.gmra.mxu1 %v3366_v22  ;;  %v4443_v34 = vadd.f32 %v1895_v12, %v1575_v43  ;;  %v3373_v12 = vld [vmem:[#allocation2 + $0xc8] sm:$0xf] }
 0x20f   : > { %v1924_v23 = vpop.f32.mrf.mxu2  ;;  %v3374_v16 = vor.u32 %v3641_v13, %v3373_v12 }
 0x210   : > { %v4446_v24 = vadd.f32 %v1924_v23, %v4386_v62  ;;  %v3377_v62 = vld [vmem:[#allocation2 + $0xd8] sm:$0xf]  ;;  %v3385_v23 = vld [vmem:[#allocation2 + $0xe0] sm:$0xf] }
 0x211   : > { %v3378_v3 = vor.u32 %v3643_v40, %v3377_v62 }
 0x213   : > { %v1576_v30 = vpop.f32.mrf.mxu1 }
 0x214   : > { %v1577_v31 = vadd.f32 %v1576_v30, %v1528_v42 }
 0x216   : > { %v1898_v0 = vadd.f32 %v1897_v27, %v1577_v31  ;;  %v3644_v27 = vld [vmem:[#allocation2 + $0xe8] sm:$0xf0] }
 0x217   : > { %v1926_v32 = vpop.f32.mrf.mxu2  ;;  %v3386_v30 = vor.u32 %v3644_v27, %v3385_v23 }
 0x218   : > { %v4454_v37 = vadd.f32 %v1926_v32, %v4393_v25 }
 0x21b   : > { %v1579_v45 = vpop.f32.mrf.mxu1 }
 0x21c   : > { %v1580_v6 = vadd.f32 %v1579_v45, %v4400_v26  ;;  %2478 = vmatmul.bf16.gmra.mxu2 %v3338_v41 }
 0x21e   : > { %2400 = vmatmul.bf16.gmra.mxu1 %v3378_v3  ;;  %v1901_v47 = vadd.f32 %v1900_v44, %v1580_v6 }
 0x21f   : > { %v1929_v46 = vpop.f32.mrf.mxu2 }
 0x220   : > { %v4458_v50 = vadd.f32 %v1929_v46, %v4398_v20  ;;  %v3350_v20 = vor.u32 %v3635_v53, %v3349_v9 }
 0x223   : > { %v1581_v25 = vpop.f32.mrf.mxu1 }
 0x224   : > { %v1582_v54 = vadd.f32 %v1581_v25, %v1533_v52 }
 0x226   : > { %v1903_v26 = vadd.f32 %v1902_v57, %v1582_v54 }
 0x227   : > { %v1931_v58 = vpop.f32.mrf.mxu2 }
 0x228   : > { %v4465_v60 = vadd.f32 %v1931_v58, %v4406_v49 }
 0x22c   : > { %2483 = vmatmul.bf16.gmra.mxu2 %v3350_v20 }
 0x22f   : > { %v1934_v5 = vpop.f32.mrf.mxu2 }
 0x230   : > { %v4468_v35 = vadd.f32 %v1934_v5, %v4411_v56  ;;  %v3670_v56 = vld [vmem:[%s4700_s19 + $0x8] sm:$0xff] }
 0x231   : > { %2638 = vmatpush.bf16.msra.mxu3 %v3670_v56 }
 0x235   : > { %2639 = vmatpush.bf16.msra.mxu3 %v3669_v39 }
 0x237   : > { %v1936_v61 = vpop.f32.mrf.mxu2 }
 0x238   : > { %v4474_v15 = vadd.f32 %v1936_v61, %v4421_v11  ;;  %v2366_v11 = vpop.f32.mrf.mxu1 }
 0x23c   : > { %2488 = vmatmul.bf16.gmra.mxu2 %v3362_v7 }
 0x23f   : > { %v1939_v49 = vpop.f32.mrf.mxu2 }
 0x240   : > { %v4477_v8 = vadd.f32 %v1939_v49, %v4427_v1  ;;  %v1963_v1 = vpop.f32.mrf.mxu3  ;;  %v2368_v43 = vpop.f32.mrf.mxu1 }
 0x241   : > { %v1964_v46 = vadd.f32 %v1963_v1, %v4414_v48 }
 0x247   : > { %v1941_v10 = vpop.f32.mrf.mxu2 }
 0x248   : > { %v4483_v14 = vadd.f32 %v1941_v10, %v4437_v38  ;;  %v2417_v38 = vpop.f32.mrf.mxu0  ;;  %v1965_v31 = vpop.f32.mrf.mxu3 }
 0x249   : > { %v2418_v52 = vadd.f32 %v2417_v38, %v2368_v43  ;;  %v1966_v57 = vadd.f32 %v1965_v31, %v4424_v59 }
 0x24c   : > { %2493 = vmatmul.bf16.gmra.mxu2 %v3374_v16 }
 0x24f   : > { %v1944_v19 = vpop.f32.mrf.mxu2 }
 0x250   : > { %v4486_v21 = vadd.f32 %v1944_v19, %v4443_v34  ;;  %v2371_v34 = vpop.f32.mrf.mxu1  ;;  %v2420_v29 = vpop.f32.mrf.mxu0 }
 0x251   : > { %v1968_v36 = vpop.f32.mrf.mxu3  ;;  %v2421_v63 = vadd.f32 %v2420_v29, %v2371_v34 }
 0x252   : > { %v1969_v10 = vadd.f32 %v1968_v36, %v4430_v4 }
 0x257   : > { %v1946_v22 = vpop.f32.mrf.mxu2 }
 0x258   : > { %v4491_v42 = vadd.f32 %v1946_v22, %v1898_v0  ;;  %v2373_v41 = vpop.f32.mrf.mxu1  ;;  %v2422_v44 = vpop.f32.mrf.mxu0  ;;  %v2416_v0 = vadd.f32 %v2415_v33, %v2366_v11 }
 0x259   : > { %v1970_v45 = vpop.f32.mrf.mxu3  ;;  %v2423_v59 = vadd.f32 %v2422_v44, %v2373_v41 }
 0x25a   : > { %v1971_v16 = vadd.f32 %v1970_v45, %v4440_v18 }
 0x25c   : > { %2498 = vmatmul.bf16.gmra.mxu2 %v3386_v30 }
 0x25f   : > { %v1949_v28 = vpop.f32.mrf.mxu2 }
 0x260   : > { %v4493_v32 = vadd.f32 %v1949_v28, %v1901_v47  ;;  %v2376_v51 = vpop.f32.mrf.mxu1  ;;  %v4501_v47 = vld [vmem:[%s4701_s14] ss:$0 sm:$0xff]  ;;  %v2425_v54 = vpop.f32.mrf.mxu0 }
 0x261   : > { %v1973_v58 = vpop.f32.mrf.mxu3  ;;  %v2426_v30 = vadd.f32 %v2425_v54, %v2376_v51 }
 0x262   : > { %v1974_v34 = vadd.f32 %v1973_v58, %v4446_v24 }
 0x267   : > { %v1951_v62 = vpop.f32.mrf.mxu2 }
 0x268   : > { %v4495_v40 = vadd.f32 %v1951_v62, %v1903_v26  ;;  %v2378_v17 = vpop.f32.mrf.mxu1  ;;  %v2427_v7 = vpop.f32.mrf.mxu0 }
 0x269   : > { %v1975_v56 = vpop.f32.mrf.mxu3  ;;  %v2428_v29 = vadd.f32 %v2427_v7, %v2378_v17 }
 0x26a   : > { %v1976_v44 = vadd.f32 %v1975_v56, %v4454_v37 }
 0x26f   : > { %v2464_v6 = vpop.f32.mrf.mxu2 }
 0x270   : > { %v2465_v3 = vadd.f32 %v2464_v6, %v2416_v0  ;;  %v2381_v33 = vpop.f32.mrf.mxu1  ;;  %v2430_v39 = vpop.f32.mrf.mxu0 }
 0x271   : > { %v1978_v22 = vpop.f32.mrf.mxu3 }
 0x272   : > { %v2504_v25 = vadd.f32 %v2465_v3, %v1964_v46  ;;  %v1979_v58 = vadd.f32 %v1978_v22, %v4458_v50 }
 0x274   : > { %v2524_v9 = vadd.f32 %v4501_v47, %v2504_v25 }
 0x276   : > { %v2540_v48 = vmax.f32 %v2524_v9, 0.0 }
 0x277   : > { %v2466_v55 = vpop.f32.mrf.mxu2 }
 0x278   : > { %v2467_v26 = vadd.f32 %v2466_v55, %v2418_v52  ;;  %v2383_v28 = vpop.f32.mrf.mxu1  ;;  %v2432_v18 = vpop.f32.mrf.mxu0  ;;  %v2431_v55 = vadd.f32 %v2430_v39, %v2381_v33 }
 0x279   : > { %v1980_v62 = vpop.f32.mrf.mxu3  ;;  %v2433_v9 = vadd.f32 %v2432_v18, %v2383_v28 }
 0x27a   : > { %v2505_v53 = vadd.f32 %v2467_v26, %v1966_v57 }
 0x27c   : > { %v2525_v20 = vadd.f32 %v4501_v47, %v2505_v53 }
 0x27e   : > { %v2541_v5 = vmax.f32 %v2525_v20, 0.0 }
 0x27f   : > { %v2469_v61 = vpop.f32.mrf.mxu2 }
 0x280   : > { %v2556_v2 = vpack.c.bf16 %v2541_v5, %v2540_v48  ;;  %v2470_v49 = vadd.f32 %v2469_v61, %v2421_v63  ;;  %v2386_v46 = vpop.f32.mrf.mxu1  ;;  %v2435_v25 = vpop.f32.mrf.mxu0  ;;  %v1981_v48 = vadd.f32 %v1980_v62, %v4465_v60 }
 0x281   : > { %v1983_v57 = vpop.f32.mrf.mxu3 }
 0x282   : > { %2640 = vmatmul.bf16.vlgmr.msra.gmra.mxu3 %v2556_v2  ;;  %v2506_v12 = vadd.f32 %v2470_v49, %v1969_v10 }
 0x284   : > { %v2526_v19 = vadd.f32 %v4501_v47, %v2506_v12 }
 0x286   : > { %v2542_v23 = vmax.f32 %v2526_v19, 0.0 }
 0x287   : > { %v2471_v13 = vpop.f32.mrf.mxu2 }
 0x288   : > { %v2472_v11 = vadd.f32 %v2471_v13, %v2423_v59  ;;  %v2388_v53 = vpop.f32.mrf.mxu1  ;;  %v2437_v17 = vpop.f32.mrf.mxu0  ;;  %v2436_v59 = vadd.f32 %v2435_v25, %v2386_v46 }
 0x289   : > { %v1985_v2 = vpop.f32.mrf.mxu3  ;;  %v2438_v33 = vadd.f32 %v2437_v17, %v2388_v53 }
 0x28a   : > { %v2507_v1 = vadd.f32 %v2472_v11, %v1971_v16  ;;  %v1984_v11 = vadd.f32 %v1983_v57, %v4468_v35  ;;  %v1986_v39 = vadd.f32 %v1985_v2, %v4474_v15 }
 0x28c   : > { %v2527_v43 = vadd.f32 %v4501_v47, %v2507_v1 }
 0x28e   : > { %v2543_v27 = vmax.f32 %v2527_v43, 0.0 }
 0x28f   : > { %v2474_v38 = vpop.f32.mrf.mxu2 }
 0x290   : > { %v2557_v31 = vpack.c.bf16 %v2543_v27, %v2542_v23  ;;  %v2475_v4 = vadd.f32 %v2474_v38, %v2426_v30  ;;  %v2391_v50 = vpop.f32.mrf.mxu1  ;;  %v2440_v16 = vpop.f32.mrf.mxu0 }
 0x291   : > { %v1988_v60 = vpop.f32.mrf.mxu3  ;;  %v2441_v18 = vadd.f32 %v2440_v16, %v2391_v50 }
 0x292   : > { %2645 = vmatmul.bf16.gmra.mxu3 %v2557_v31  ;;  %v2508_v36 = vadd.f32 %v2475_v4, %v1974_v34 }
 0x294   : > { %v2528_v6 = vadd.f32 %v4501_v47, %v2508_v36  ;;  %v1989_v36 = vadd.f32 %v1988_v60, %v4477_v8 }
 0x296   : > { %v2544_v51 = vmax.f32 %v2528_v6, 0.0 }
 0x297   : > { %v2476_v41 = vpop.f32.mrf.mxu2 }
 0x298   : > { %v2477_v45 = vadd.f32 %v2476_v41, %v2428_v29  ;;  %v2393_v27 = vpop.f32.mrf.mxu1  ;;  %v2442_v30 = vpop.f32.mrf.mxu0 }
 0x299   : > { %v1990_v28 = vpop.f32.mrf.mxu3  ;;  %v2443_v15 = vadd.f32 %v2442_v30, %v2393_v27 }
 0x29a   : > { %v2509_v0 = vadd.f32 %v2477_v45, %v1976_v44  ;;  %v1991_v6 = vadd.f32 %v1990_v28, %v4483_v14 }
 0x29c   : > { %v2529_v3 = vadd.f32 %v4501_v47, %v2509_v0 }
 0x29e   : > { %v2545_v52 = vmax.f32 %v2529_v3, 0.0 }
 0x29f   : > { %v2479_v54 = vpop.f32.mrf.mxu2 }
 0x2a0   : > { %v2558_v24 = vpack.c.bf16 %v2545_v52, %v2544_v51  ;;  %v2480_v26 = vadd.f32 %v2479_v54, %v2431_v55  ;;  %v2396_v62 = vpop.f32.mrf.mxu1  ;;  %v2445_v44 = vpop.f32.mrf.mxu0 }
 0x2a1   : > { %v1993_v3 = vpop.f32.mrf.mxu3  ;;  %v2446_v57 = vadd.f32 %v2445_v44, %v2396_v62 }
 0x2a2   : > { %2650 = vmatmul.bf16.gmra.mxu3 %v2558_v24  ;;  %v2510_v37 = vadd.f32 %v2480_v26, %v1979_v58 }
 0x2a4   : > { %v2530_v61 = vadd.f32 %v4501_v47, %v2510_v37  ;;  %v1994_v37 = vadd.f32 %v1993_v3, %v4486_v21  ;;  %v3800_v3 = vld [vmem:[%s4196_s3 + $0x18] sm:$0xff] }
 0x2a6   : > { %v2546_v49 = vmax.f32 %v2530_v61, 0.0 }
 0x2a7   : > { %v2481_v20 = vpop.f32.mrf.mxu2 }
 0x2a8   : > { %v2482_v5 = vadd.f32 %v2481_v20, %v2433_v9  ;;  %v2398_v55 = vpop.f32.mrf.mxu1  ;;  %v2447_v26 = vpop.f32.mrf.mxu0 }
 0x2a9   : > { %v1995_v9 = vpop.f32.mrf.mxu3  ;;  %v2448_v14 = vadd.f32 %v2447_v26, %v2398_v55  ;;  %v3802_v26 = vld [vmem:[%s4196_s3 + $0x28] sm:$0xff] }
 0x2aa   : > { %v2511_v63 = vadd.f32 %v2482_v5, %v1981_v48  ;;  %v1996_v48 = vadd.f32 %v1995_v9, %v4491_v42 }
 0x2ac   : > { %v2531_v7 = vadd.f32 %v4501_v47, %v2511_v63 }
 0x2ae   : > { %v2547_v56 = vmax.f32 %v2531_v7, 0.0 }
 0x2af   : > { %v2484_v10 = vpop.f32.mrf.mxu2 }
 0x2b0   : > { %v2559_v12 = vpack.c.bf16 %v2547_v56, %v2546_v49  ;;  %v2485_v13 = vadd.f32 %v2484_v10, %v2436_v59  ;;  %v2401_v17 = vpop.f32.mrf.mxu1  ;;  %v2450_v2 = vpop.f32.mrf.mxu0 }
 0x2b1   : > { %v1998_v49 = vpop.f32.mrf.mxu3 }
 0x2b2   : > { %2655 = vmatmul.bf16.gmra.mxu3 %v2559_v12  ;;  %v2512_v19 = vadd.f32 %v2485_v13, %v1984_v11  ;;  %v2451_v12 = vadd.f32 %v2450_v2, %v2401_v17  ;;  %v1999_v16 = vadd.f32 %v1998_v49, %v4493_v32  ;;  %v4537_v32 = vld [vmem:[%s4702_s22] ss:$0 sm:$0xff] }
 0x2b4   : > { %v2532_v22 = vadd.f32 %v4501_v47, %v2512_v19 }
 0x2b6   : > { %v2548_v31 = vmax.f32 %v2532_v22, 0.0 }
 0x2b7   : > { %v2486_v1 = vpop.f32.mrf.mxu2 }
 0x2b8   : > { %v2487_v43 = vadd.f32 %v2486_v1, %v2438_v33  ;;  %v2403_v13 = vpop.f32.mrf.mxu1  ;;  %v2452_v42 = vpop.f32.mrf.mxu0 }
 0x2b9   : > { %v2453_v11 = vadd.f32 %v2452_v42, %v2403_v13  ;;  %v2000_v33 = vpop.f32.mrf.mxu3 }
 0x2ba   : > { %v2513_v23 = vadd.f32 %v2487_v43, %v1986_v39  ;;  %v2001_v1 = vadd.f32 %v2000_v33, %v4495_v40 }
 0x2bc   : > { %v2533_v38 = vadd.f32 %v4501_v47, %v2513_v23 }
 0x2be   : > { %v2549_v4 = vmax.f32 %v2533_v38, 0.0 }
 0x2bf   : > { %v2489_v34 = vpop.f32.mrf.mxu2 }
 0x2c0   : > { %v2560_v35 = vpack.c.bf16 %v2549_v4, %v2548_v31  ;;  %v2490_v29 = vadd.f32 %v2489_v34, %v2441_v18  ;;  %v3797_v4 = vld [vmem:[%s4196_s3] sm:$0xff] }
 0x2c2   : > { %2660 = vmatmul.bf16.gmra.mxu3 %v2560_v35  ;;  %v2514_v41 = vadd.f32 %v2490_v29, %v1989_v36  ;;  %v3798_v35 = vld [vmem:[%s4196_s3 + $0x8] sm:$0xff] }
 0x2c4   : > { %v2534_v46 = vadd.f32 %v4501_v47, %v2514_v41  ;;  %v3799_v41 = vld [vmem:[%s4196_s3 + $0x10] sm:$0xff] }
 0x2c6   : > { %v2550_v25 = vmax.f32 %v2534_v46, 0.0 }
 0x2c7   : > { %v2491_v45 = vpop.f32.mrf.mxu2 }
 0x2c8   : > { %v2492_v0 = vadd.f32 %v2491_v45, %v2443_v15 }
 0x2ca   : > { %v2515_v51 = vadd.f32 %v2492_v0, %v1991_v6 }
 0x2cc   : > { %v2535_v52 = vadd.f32 %v4501_v47, %v2515_v51 }
 0x2ce   : > { %v2551_v54 = vmax.f32 %v2535_v52, 0.0 }
 0x2cf   : > { %v2494_v24 = vpop.f32.mrf.mxu2 }
 0x2d0   : > { %v2561_v8 = vpack.c.bf16 %v2551_v54, %v2550_v25  ;;  %v2495_v58 = vadd.f32 %v2494_v24, %v2446_v57  ;;  %v3801_v54 = vld [vmem:[%s4196_s3 + $0x20] sm:$0xff] }
 0x2d2   : > { %2665 = vmatmul.bf16.gmra.mxu3 %v2561_v8  ;;  %v2516_v53 = vadd.f32 %v2495_v58, %v1994_v37 }
 0x2d4   : > { %v2536_v61 = vadd.f32 %v4501_v47, %v2516_v53  ;;  %v3803_v53 = vld [vmem:[%s4196_s3 + $0x30] sm:$0xff] }
 0x2d6   : > { %v2552_v56 = vmax.f32 %v2536_v61, 0.0  ;;  %v3804_v61 = vld [vmem:[%s4196_s3 + $0x38] sm:$0xff] }
 0x2d7   : > { %v2496_v20 = vpop.f32.mrf.mxu2 }
 0x2d8   : > { %v2497_v5 = vadd.f32 %v2496_v20, %v2448_v14 }
 0x2da   : > { %v2517_v63 = vadd.f32 %v2497_v5, %v1996_v48 }
 0x2dc   : > { %v2537_v7 = vadd.f32 %v4501_v47, %v2517_v63 }
 0x2de   : > { %v2553_v10 = vmax.f32 %v2537_v7, 0.0 }
 0x2df   : > { %v2499_v59 = vpop.f32.mrf.mxu2 }
 0x2e0   : > { %v2562_v50 = vpack.c.bf16 %v2553_v10, %v2552_v56  ;;  %v2500_v21 = vadd.f32 %v2499_v59, %v2451_v12  ;;  %v3805_v56 = vld [vmem:[%s4196_s3 + $0x40] sm:$0xff] }
 0x2e2   : > { %2670 = vmatmul.bf16.gmra.mxu3 %v2562_v50  ;;  %v2518_v60 = vadd.f32 %v2500_v21, %v1999_v16  ;;  %v3806_v21 = vld [vmem:[%s4196_s3 + $0x48] sm:$0xff] }
 0x2e4   : > { %v2538_v43 = vadd.f32 %v4501_v47, %v2518_v60  ;;  %v3807_v60 = vld [vmem:[%s4196_s3 + $0x50] sm:$0xff] }
 0x2e6   : > { %v2554_v27 = vmax.f32 %v2538_v43, 0.0  ;;  %v3808_v43 = vld [vmem:[%s4196_s3 + $0x58] sm:$0xff] }
 0x2e7   : > { %v2501_v19 = vpop.f32.mrf.mxu2 }
 0x2e8   : > { %v2502_v39 = vadd.f32 %v2501_v19, %v2453_v11 }
 0x2ea   : > { %v2519_v22 = vadd.f32 %v2502_v39, %v2001_v1 }
 0x2ec   : > { %v2539_v23 = vadd.f32 %v4501_v47, %v2519_v22 }
 0x2ee   : > { %v2555_v38 = vmax.f32 %v2539_v23, 0.0 }
 0x2f0   : > { %v2563_v30 = vpack.c.bf16 %v2555_v38, %v2554_v27 }
 0x2f2   : > { %2675 = vmatmul.bf16.gmra.mxu3 %v2563_v30  ;;  %v3809_v30 = vld [vmem:[%s4196_s3 + $0x60] sm:$0xff] }
 0x305   : > { %v2641_v31 = vpop.f32.mrf.mxu3 }
 0x306   : > { %v2642_v40 = vadd.f32 %v4537_v32, %v2641_v31 }
 0x308   : > { %v2681_v28 = vadd.f32 %v3797_v4, %v2642_v40 }
 0x30a   : > { %v2697_v34 = vmax.f32 %v2681_v28, 0.0 }
 0x30c   : > { %2713 = vst.msk [vmem:[%s4543_s17] sm:$0xff] %vm448_vm0, %v2697_v34  ;;  %v3810_v34 = vld [vmem:[%s4196_s3 + $0x68] sm:$0xff] }
 0x30d   : > { %v2643_v47 = vpop.f32.mrf.mxu3 }
 0x30e   : > { %v2644_v18 = vadd.f32 %v4537_v32, %v2643_v47 }
 0x310   : > { %v2682_v29 = vadd.f32 %v3798_v35, %v2644_v18 }
 0x312   : > { %v2698_v36 = vmax.f32 %v2682_v29, 0.0 }
 0x314   : > { %2714 = vst.msk [vmem:[%s4543_s17 + $0x8] sm:$0xff] %vm448_vm0, %v2698_v36  ;;  %v3811_v36 = vld [vmem:[%s4196_s3 + $0x70] sm:$0xff] }
 0x315   : > { %v2646_v62 = vpop.f32.mrf.mxu3 }
 0x316   : > { %v2647_v15 = vadd.f32 %v4537_v32, %v2646_v62 }
 0x318   : > { %v2683_v44 = vadd.f32 %v3799_v41, %v2647_v15 }
 0x31a   : > { %v2699_v45 = vmax.f32 %v2683_v44, 0.0 }
 0x31c   : > { %2715 = vst.msk [vmem:[%s4543_s17 + $0x10] sm:$0xff] %vm448_vm0, %v2699_v45  ;;  %v3812_v45 = vld [vmem:[%s4196_s3 + $0x78] sm:$0xff] }
 0x31d   : > { %v2648_v6 = vpop.f32.mrf.mxu3 }
 0x31e   : > { %v2649_v0 = vadd.f32 %v4537_v32, %v2648_v6 }
 0x320   : > { %v2684_v46 = vadd.f32 %v3800_v3, %v2649_v0 }
 0x322   : > { %v2700_v51 = vmax.f32 %v2684_v46, 0.0 }
 0x324   : > { %2716 = vst.msk [vmem:[%s4543_s17 + $0x18] sm:$0xff] %vm448_vm0, %v2700_v51 }
 0x325   : > { %v2651_v52 = vpop.f32.mrf.mxu3 }
 0x326   : > { %v2652_v25 = vadd.f32 %v4537_v32, %v2651_v52 }
 0x328   : > { %v2685_v55 = vadd.f32 %v3801_v54, %v2652_v25 }
 0x32a   : > { %v2701_v24 = vmax.f32 %v2685_v55, 0.0 }
 0x32c   : > { %2717 = vst.msk [vmem:[%s4543_s17 + $0x20] sm:$0xff] %vm448_vm0, %v2701_v24 }
 0x32d   : > { %v2653_v57 = vpop.f32.mrf.mxu3 }
 0x32e   : > { %v2654_v8 = vadd.f32 %v4537_v32, %v2653_v57 }
 0x330   : > { %v2686_v58 = vadd.f32 %v3802_v26, %v2654_v8 }
 0x332   : > { %v2702_v9 = vmax.f32 %v2686_v58, 0.0 }
 0x334   : > { %2718 = vst.msk [vmem:[%s4543_s17 + $0x28] sm:$0xff] %vm448_vm0, %v2702_v9 }
 0x335   : > { %v2656_v37 = vpop.f32.mrf.mxu3 }
 0x336   : > { %v2657_v14 = vadd.f32 %v4537_v32, %v2656_v37 }
 0x338   : > { %v2687_v20 = vadd.f32 %v3803_v53, %v2657_v14 }
 0x33a   : > { %v2703_v48 = vmax.f32 %v2687_v20, 0.0 }
 0x33c   : > { %2719 = vst.msk [vmem:[%s4543_s17 + $0x30] sm:$0xff] %vm448_vm0, %v2703_v48 }
 0x33d   : > { %v2658_v5 = vpop.f32.mrf.mxu3 }
 0x33e   : > { %v2659_v17 = vadd.f32 %v4537_v32, %v2658_v5 }
 0x340   : > { %v2688_v63 = vadd.f32 %v3804_v61, %v2659_v17 }
 0x342   : > { %v2704_v2 = vmax.f32 %v2688_v63, 0.0 }
 0x344   : > { %2720 = vst.msk [vmem:[%s4543_s17 + $0x38] sm:$0xff] %vm448_vm0, %v2704_v2 }
 0x345   : > { %v2661_v7 = vpop.f32.mrf.mxu3 }
 0x346   : > { %v2662_v49 = vadd.f32 %v4537_v32, %v2661_v7 }
 0x348   : > { %v2689_v10 = vadd.f32 %v3805_v56, %v2662_v49 }
 0x34a   : > { %v2705_v59 = vmax.f32 %v2689_v10, 0.0 }
 0x34c   : > { %2721 = vst.msk [vmem:[%s4543_s17 + $0x40] sm:$0xff] %vm448_vm0, %v2705_v59 }
 0x34d   : > { %v2663_v12 = vpop.f32.mrf.mxu3 }
 0x34e   : > { %v2664_v50 = vadd.f32 %v4537_v32, %v2663_v12 }
 0x350   : > { %v2690_v13 = vadd.f32 %v3806_v21, %v2664_v50 }
 0x352   : > { %v2706_v16 = vmax.f32 %v2690_v13, 0.0 }
 0x354   : > { %2722 = vst.msk [vmem:[%s4543_s17 + $0x48] sm:$0xff] %vm448_vm0, %v2706_v16 }
 0x355   : > { %v2666_v42 = vpop.f32.mrf.mxu3 }
 0x356   : > { %v2667_v11 = vadd.f32 %v4537_v32, %v2666_v42 }
 0x358   : > { %v2691_v33 = vadd.f32 %v3807_v60, %v2667_v11 }
 0x35a   : > { %v2707_v19 = vmax.f32 %v2691_v33, 0.0 }
 0x35c   : > { %2723 = vst.msk [vmem:[%s4543_s17 + $0x50] sm:$0xff] %vm448_vm0, %v2707_v19 }
 0x35d   : > { %v2668_v1 = vpop.f32.mrf.mxu3 }
 0x35e   : > { %v2669_v39 = vadd.f32 %v4537_v32, %v2668_v1 }
 0x360   : > { %v2692_v22 = vadd.f32 %v3808_v43, %v2669_v39 }
 0x362   : > { %v2708_v23 = vmax.f32 %v2692_v22, 0.0 }
 0x364   : > { %2724 = vst.msk [vmem:[%s4543_s17 + $0x58] sm:$0xff] %vm448_vm0, %v2708_v23 }
 0x365   : > { %v2671_v27 = vpop.f32.mrf.mxu3 }
 0x366   : > { %v2672_v38 = vadd.f32 %v4537_v32, %v2671_v27 }
 0x368   : > { %v2693_v31 = vadd.f32 %v3809_v30, %v2672_v38 }
 0x36a   : > { %v2709_v40 = vmax.f32 %v2693_v31, 0.0 }
 0x36c   : > { %2725 = vst.msk [vmem:[%s4543_s17 + $0x60] sm:$0xff] %vm448_vm0, %v2709_v40 }
 0x36d   : > { %v2673_v4 = vpop.f32.mrf.mxu3 }
 0x36e   : > { %v2674_v28 = vadd.f32 %v4537_v32, %v2673_v4 }
 0x370   : > { %v2694_v47 = vadd.f32 %v3810_v34, %v2674_v28 }
 0x372   : > { %v2710_v18 = vmax.f32 %v2694_v47, 0.0 }
 0x374   : > { %2726 = vst.msk [vmem:[%s4543_s17 + $0x68] sm:$0xff] %vm448_vm0, %v2710_v18 }
 0x375   : > { %v2676_v35 = vpop.f32.mrf.mxu3 }
 0x376   : > { %v2677_v29 = vadd.f32 %v4537_v32, %v2676_v35 }
 0x378   : > { %v2695_v62 = vadd.f32 %v3811_v36, %v2677_v29 }
 0x37a   : > { %v2711_v15 = vmax.f32 %v2695_v62, 0.0 }
 0x37c   : > { %2727 = vst.msk [vmem:[%s4543_s17 + $0x70] sm:$0xff] %vm448_vm0, %v2711_v15 }
 0x37d   : > { %v2678_v41 = vpop.f32.mrf.mxu3 }
 0x37e   : > { %v2679_v44 = vadd.f32 %v4537_v32, %v2678_v41 }
 0x380   : > { %v2696_v6 = vadd.f32 %v3812_v45, %v2679_v44 }
 0x382   : > { %v2712_v0 = vmax.f32 %v2696_v6, 0.0 }
 0x384   : > { %2728 = vst.msk [vmem:[%s4543_s17 + $0x78] sm:$0xff] %vm448_vm0, %v2712_v0 }
 0x385   : > { %3930 = shalt.err (!%p3927_p5)
}
 0x386   : > { %s4016_s27 = smov 128   ;;  %s4017_s22 = smov 8  }
 0x387   : > { %3702 = dma.vmem_to_hbm [thread:$0]  (%p4147_p3), %s2746_s26, 2048, %s2748_s21, %s2730_s13, %s4016_s27, %s4016_s27, %s4017_s22  }
 0x388 PF: > { %s4706_s17 = sld [smem:[#allocation14_spill]]  ;;  %p3722_p7 = scmp.ge.s32.totalorder %s4009_s12, 2 }
 0x38a   : > { %p3716_p9 = pnand %p3722_p7, %p4118_p6 }
 0x38c   : > { %p3717_p2 = pneg %p3716_p9 }
 0x38e   : > { %s2762_s9 = sand.u32 1, %s4706_s17  }
 0x38f   : > { %s2763_s23 = scalar_lea.sflag [#allocation5], %s2762_s9 }
 0x390   : > { %3976 = dma.done.wait (%p3717_p2), %s2763_s23, 2048  }
 0x391   : > { %3978 = vsyncadd (%p3717_p2), %s2763_s23, 4294965248  ;;  %s27_s12 = sadd.s32 1, %s4009_s12   ;;  %s4708_s24 = sld [smem:[#allocation15_spill]] }
 0x392   : > { %p24_p1 = scmp.ge.s32.totalorder %s27_s12, 6   ;;  %s4709_s29 = sld [smem:[#allocation21_spill]] }
 0x393   : > { %s4710_s18 = sld [smem:[#allocation18_spill]]  ;;  %s4712_s27 = smov %s3985_s28 }
 0x394   : > { %s4711_s5 = sld [smem:[#allocation20_spill]]  ;;  %s4714_s30 = smov %s4001_s10 }
 0x395   : > { %s4715_s9 = smov %s4005_s11 }
 0x396   :  { %26 = sbr.rel (!%p24_p1) target bundleno = 16 (0x10), region = 118 }
 0x397   : > { %s4713_s28 = smov %s4708_s24 }
 0x399   : > { %s4716_s10 = smov %s4710_s18 }
 0x39a   : > { %s4717_s11 = smov %s4711_s5 }
 0x39b   :  { %2769 = vsyncpa [#allocation4], 1 }
 0x39c   :  { %2771 = vsyncpa [#allocation4 + $0x1], 1 }
 0x39d   :  { %2772 = vsyncpa [#allocation7], 1 }
 0x39e   :  { %2774 = vsyncpa [#allocation7 + $0x1], 1 }
 0x39f   :  { %2775 = vsyncpa [#allocation5], 1 }
 0x3a0   :  { %2777 = vsyncpa [#allocation5 + $0x1], 1 }

</bundles_post_ra>
